<compile_context>
chip_gen: v6e
topology: v6e:2x2x1
jax: 0.10.0
libtpu: 0.0.40
codegen_flags: <defaults>
</compile_context>

<pallas_src>
import functools

import numpy as np
import jax
import jax.numpy as jnp
from jax.experimental import pallas as pl
from jax.experimental.pallas import tpu as pltpu


def _round_up(n, m):
    return ((n + m - 1) // m) * m


def _choose_tt(T, tb, hp, op, cap=128, budget_bytes=6 << 20):
    """Timesteps per sequential grid step, sized against a VMEM budget for
    the (double-buffered) activation blocks moved per step."""
    per_t = 4 * tb * (2 * hp + 2 * op)          # f32 input block + y block, 2 bufs
    tt = min(T, cap, max(1, budget_bytes // max(per_t, 1)))
    return max(1, int(tt))


def _vmem_limit_bytes():
    """Scoped-VMEM limit with headroom (v5e default is only 16 MiB; v7x has
    just 64 MiB physical per TensorCore)."""
    try:
        cap = int(pltpu.get_tpu_info().vmem_capacity_bytes)
        return int(min(96 << 20, (cap * 3) // 4))
    except Exception:
        return 32 << 20


# ---------------------------------------------------------------------------
# Probe: is pipeline_mode=pl.Buffered(1) (single-buffered resident weights)
# supported by this runtime?  Falls back to default double-buffering if not,
# so the kernel always runs.
# ---------------------------------------------------------------------------
def _buffered_probe_kernel(x_ref, o_ref):
    o_ref[...] = x_ref[...] + 1.0


@functools.lru_cache(maxsize=1)
def _single_buffer_supported():
    try:
        x = jnp.arange(8 * 128, dtype=jnp.float32).reshape(8, 128)
        out = pl.pallas_call(
            _buffered_probe_kernel,
            out_shape=jax.ShapeDtypeStruct((16, 128), jnp.float32),
            grid=(2,),
            in_specs=[pl.BlockSpec((8, 128), lambda i: (0, 0),
                                   pipeline_mode=pl.Buffered(1))],
            out_specs=pl.BlockSpec((8, 128), lambda i: (i, 0)),
        )(x)
        np.testing.assert_allclose(np.asarray(out),
                                   np.tile(np.asarray(x) + 1.0, (2, 1)))
        return True
    except Exception:
        return False


# ---------------------------------------------------------------------------
# Fused kernel: per block of TT timesteps
#   U_t = x_t @ Wxh          (or gathered embedding row for token ids)
#   h_t = tanh(U_t + b + h_{t-1} @ Whh)      <- only this is serial
#   y_t = softmax(h_t @ Wout + bout)
# The hidden state is carried across time blocks in a VMEM scratch; hT is
# written once, at the last time block.
# ---------------------------------------------------------------------------
def _esn_fused_kernel(*refs, tt, t_valid, project_input, apply_softmax,
                      compute_dtype, unroll):
    if project_input:
        (x_ref, h0_ref, whh_ref, wxh_ref, b_ref, wout_ref, bout_ref,
         y_ref, hT_ref, h_scr) = refs
    else:
        (u_ref, h0_ref, whh_ref, b_ref, wout_ref, bout_ref,
         y_ref, hT_ref, h_scr) = refs

    t_blk = pl.program_id(1)

    @pl.when(t_blk == 0)
    def _():
        h_scr[...] = h0_ref[...]

    bias = b_ref[...]          # (1, Hp) f32
    bout = bout_ref[...]       # (1, Op) f32 (padded cols already -1e30)

    def step(i, h):
        # Input projection: independent of h -> overlaps with the serial chain.
        if project_input:
            u_t = jnp.dot(x_ref[i].astype(compute_dtype), wxh_ref[...],
                          preferred_element_type=jnp.float32)
        else:
            u_t = u_ref[i].astype(jnp.float32)

        # Serial part: h @ Whh + tanh (Whh streamed from VMEM inside the loop,
        # not hoisted, to keep vreg live ranges short).
        pre = u_t + bias + jnp.dot(h.astype(compute_dtype), whh_ref[...],
                                   preferred_element_type=jnp.float32)
        h_new = jnp.tanh(pre)
        if t_valid is not None:
            # Trailing padded timesteps (non-divisor T): freeze the hidden
            # state; the padded y rows are sliced off in the wrapper.
            h_new = jnp.where(t_blk * tt + i < t_valid, h_new, h)

        # Fused output projection + softmax (independent of the next step).
        out_t = (jnp.dot(h_new.astype(compute_dtype), wout_ref[...],
                         preferred_element_type=jnp.float32) + bout)
        if apply_softmax:
            m = jnp.max(out_t, axis=-1, keepdims=True)
            e = jnp.exp(out_t - m)
            out_t = e * pl.reciprocal(jnp.sum(e, axis=-1, keepdims=True),
                                      approx=True)
        y_ref[i] = out_t.astype(y_ref.dtype)
        return h_new

    h_last = jax.lax.fori_loop(0, tt, step, h_scr[...],
                               unroll=min(tt, unroll))
    h_scr[...] = h_last

    @pl.when(t_blk == pl.num_programs(1) - 1)
    def _():
        hT_ref[...] = h_last


# ---------------------------------------------------------------------------
# Wrapper
# ---------------------------------------------------------------------------
def esn_forward(x, h0, wxh, whh, b, wout, bout, logits=False,
                compute_dtype=jnp.bfloat16, batch_block=None,
                max_timesteps_per_block=128):
    """x: (T, B, I) float inputs or (T, B) int token ids.  Returns (y, h_final).

    compute_dtype: dtype of the matmul operands (bf16 default for MXU
    throughput; accumulation, tanh and softmax stay in f32).
    batch_block: rows per block on the "parallel" batch grid axis; pass e.g. 8
    with large batches on v7x so both TensorCores share the serial recurrence.
    """
    f32 = jnp.float32
    I, H = wxh.shape
    O = wout.shape[1]
    Hp, Op = _round_up(H, 128), _round_up(O, 128)

    if x.ndim == 2:
        T, B = x.shape
        token_ids = True
    else:
        T, B, _ = x.shape
        token_ids = False

    Bp = _round_up(B, 8)
    if batch_block is None:
        tb = Bp
    else:
        tb = max(8, _round_up(int(batch_block), 8))
        Bp = _round_up(Bp, tb)
    nb = Bp // tb

    tt = _choose_tt(T, tb, Hp, Op, cap=max_timesteps_per_block)
    nt = -(-T // tt)
    T_pad = nt * tt
    tail = T_pad != T

    # --- parameters: pad to hardware tiles; weights in the compute dtype ----
    wxh_f32 = jnp.pad(wxh.astype(f32), ((0, 0), (0, Hp - H)))
    wxh_p = wxh_f32.astype(compute_dtype)
    whh_p = jnp.pad(whh.astype(f32),
                    ((0, Hp - H), (0, Hp - H))).astype(compute_dtype)
    wout_p = jnp.pad(wout.astype(f32),
                     ((0, Hp - H), (0, Op - O))).astype(compute_dtype)
    b_p = jnp.pad(b.astype(f32), (0, Hp - H)).reshape(1, Hp)
    # Padded logit columns get a hugely negative bias -> no in-kernel softmax
    # mask needed; the padded y columns are sliced off below.
    bout_p = jnp.pad(bout.astype(f32).reshape(1, O), ((0, 0), (0, Op - O)),
                     constant_values=-1e30)

    if h0 is None:
        h0 = jnp.zeros((B, H), f32)
    h0_p = jnp.pad(h0.astype(f32), ((0, Bp - B), (0, Hp - H)))

    # --- activations ---------------------------------------------------------
    if token_ids:
        # Single fused gather straight into the padded (T_pad, Bp, Hp) layout.
        # TODO(synk): jnp.take clamps out-of-range ids; the one_hot reference
        # would produce an all-zero row for invalid ids.
        ids = jnp.pad(x.astype(jnp.int32), ((0, T_pad - T), (0, Bp - B)))
        act = jnp.take(wxh_f32, ids, axis=0)            # (T_pad, Bp, Hp) f32
        project_input = False
    else:
        act = jnp.pad(x.astype(f32),
                      ((0, T_pad - T), (0, Bp - B), (0, 0)))  # (T_pad, Bp, I)
        project_input = True
    act_last = act.shape[-1]

    # --- specs ---------------------------------------------------------------
    sb = _single_buffer_supported()

    def const_spec(shape):
        zeros = (0,) * len(shape)
        if sb:
            return pl.BlockSpec(shape, lambda *_: zeros,
                                pipeline_mode=pl.Buffered(1))
        return pl.BlockSpec(shape, lambda *_: zeros)

    in_specs = [
        pl.BlockSpec((tt, tb, act_last), lambda bb, t: (t, bb, 0)),  # x or U
        pl.BlockSpec((tb, Hp), lambda bb, t: (bb, 0)),               # h0
        const_spec((Hp, Hp)),                                        # Whh
    ]
    args = [act, h0_p, whh_p]
    if project_input:
        in_specs.append(const_spec((I, Hp)))                         # Wxh
        args.append(wxh_p)
    in_specs += [const_spec((1, Hp)),                                # b
                 const_spec((Hp, Op)),                               # Wout
                 const_spec((1, Op))]                                # bout
    args += [b_p, wout_p, bout_p]

    out_shape = (jax.ShapeDtypeStruct((T_pad, Bp, Op), f32),
                 jax.ShapeDtypeStruct((Bp, Hp), f32))
    out_specs = (pl.BlockSpec((tt, tb, Op), lambda bb, t: (t, bb, 0)),  # y
                 pl.BlockSpec((tb, Hp), lambda bb, t: (bb, 0)))         # hT

    kernel = functools.partial(
        _esn_fused_kernel,
        tt=tt,
        t_valid=(T if tail else None),
        project_input=project_input,
        apply_softmax=not logits,
        compute_dtype=compute_dtype,
        unroll=8)

    y3, hT_p = pl.pallas_call(
        kernel,
        out_shape=out_shape,
        grid=(nb, nt),
        in_specs=in_specs,
        out_specs=out_specs,
        scratch_shapes=[pltpu.VMEM((tb, Hp), f32)],       # carried hidden state
        compiler_params=pltpu.CompilerParams(
            dimension_semantics=("parallel", "arbitrary"),
            vmem_limit_bytes=_vmem_limit_bytes()),
    )(*args)

    return y3[:T, :B, :O], hT_p[:B, :H]


# ---------------------------------------------------------------------------
# Parameter init (mirrors the module __init__) and pure-JAX reference
# ---------------------------------------------------------------------------
def init_esn_params(key, input_size, hidden_size, output_size,
                    spectral_radius=2.0, sparsity=0.9):
    k1, k2, k3, k4 = jax.random.split(key, 4)
    wxh = jax.random.normal(k1, (input_size, hidden_size), jnp.float32) * 0.1
    whh = jax.random.normal(k2, (hidden_size, hidden_size), jnp.float32) * 0.1
    b = jnp.zeros((hidden_size,), jnp.float32)

    # Echo-state surgery on Whh (host numpy; non-symmetric eigvals not on TPU).
    whh_np = np.asarray(whh)
    mask = np.asarray(jax.random.uniform(k3, whh_np.shape)) > sparsity
    whh_np = whh_np * mask
    max_abs_eig = max(float(np.abs(np.linalg.eigvals(whh_np)).max()), 1e-6)
    whh_np = whh_np / max_abs_eig * spectral_radius
    whh = jnp.asarray(whh_np, jnp.float32)

    std = np.sqrt(2.0 / (hidden_size + output_size))   # xavier_normal_
    wout = jax.random.normal(k4, (hidden_size, output_size), jnp.float32) * std
    bout = jnp.zeros((output_size,), jnp.float32)
    return wxh, whh, b, wout, bout


def esn_forward_ref(x, h0, wxh, whh, b, wout, bout, logits=False):
    def step(h, x_t):
        h_new = jnp.tanh(x_t @ wxh + h @ whh + b)
        return h_new, h_new
    hT, z = jax.lax.scan(step, h0, x)
    y = z @ wout + bout
    if not logits:
        y = jax.nn.softmax(y, axis=-1)
    return y, hT


if __name__ == "__main__":
    T, B, I, H, O = 8, 2, 8, 32, 16
    key = jax.random.PRNGKey(0)
    kx, kp, kid, kb = jax.random.split(key, 4)

    x = jax.random.normal(kx, (T, B, I), jnp.float32)
    wxh, whh, b, wout, bout = init_esn_params(kp, I, H, O)
    h0 = jnp.zeros((B, H), jnp.float32)

    y_ref_, hT_ref_ = esn_forward_ref(x, h0, wxh, whh, b, wout, bout)

    # 1) Dense input, softmax, exact f32 compute path (tight parity check).
    y, hT = esn_forward(x, h0, wxh, whh, b, wout, bout,
                        compute_dtype=jnp.float32)
    jax.block_until_ready((y, hT))
    np.testing.assert_allclose(np.asarray(hT), np.asarray(hT_ref_),
                               rtol=1e-4, atol=1e-4)
    # approx=True softmax reciprocal -> slightly looser tolerance on y.
    np.testing.assert_allclose(np.asarray(y), np.asarray(y_ref_),
                               rtol=2e-3, atol=2e-3)

    # 2) logits=True path (skips softmax).
    yl, _ = esn_forward(x, h0, wxh, whh, b, wout, bout, logits=True,
                        compute_dtype=jnp.float32)
    yl = jax.block_until_ready(yl)
    yl_ref, _ = esn_forward_ref(x, h0, wxh, whh, b, wout, bout, logits=True)
    np.testing.assert_allclose(np.asarray(yl), np.asarray(yl_ref),
                               rtol=1e-4, atol=1e-4)

    # 3) Token-id (2-D x) path: embedding gather instead of one_hot + matmul.
    x_ids = jax.random.randint(kid, (T, B), 0, I)
    y_id, hT_id = esn_forward(x_ids, h0, wxh, whh, b, wout, bout,
                              compute_dtype=jnp.float32)
    jax.block_until_ready((y_id, hT_id))
    x_oh = jax.nn.one_hot(x_ids, I, dtype=jnp.float32)
    y_id_ref, hT_id_ref = esn_forward_ref(x_oh, h0, wxh, whh, b, wout, bout)
    np.testing.assert_allclose(np.asarray(y_id), np.asarray(y_id_ref),
                               rtol=2e-3, atol=2e-3)
    np.testing.assert_allclose(np.asarray(hT_id), np.asarray(hT_id_ref),
                               rtol=1e-4, atol=1e-4)

    # 4) bf16 matmul-operand path (performance default) — loose smoke check.
    y_bf, hT_bf = esn_forward(x, h0, wxh, whh, b, wout, bout)
    jax.block_until_ready((y_bf, hT_bf))
    np.testing.assert_allclose(np.asarray(y_bf), np.asarray(y_ref_),
                               rtol=5e-2, atol=5e-2)
    np.testing.assert_allclose(np.asarray(hT_bf), np.asarray(hT_ref_),
                               rtol=2e-1, atol=2e-1)

    # 5) Batch-parallel grid axis (v7x) + non-divisor-T tail masking.
    T2, B2 = 10, 16
    x2 = jax.random.normal(kb, (T2, B2, I), jnp.float32)
    h02 = jax.random.normal(jax.random.PRNGKey(1), (B2, H), jnp.float32) * 0.1
    y2, hT2 = esn_forward(x2, h02, wxh, whh, b, wout, bout,
                          compute_dtype=jnp.float32, batch_block=8,
                          max_timesteps_per_block=4)
    jax.block_until_ready((y2, hT2))
    y2_ref, hT2_ref = esn_forward_ref(x2, h02, wxh, whh, b, wout, bout)
    np.testing.assert_allclose(np.asarray(hT2), np.asarray(hT2_ref),
                               rtol=1e-4, atol=1e-4)
    np.testing.assert_allclose(np.asarray(y2), np.asarray(y2_ref),
                               rtol=2e-3, atol=2e-3)

    print("KERNEL_OK")
</pallas_src>

<mosaic_0001>
module attributes {stable_mosaic.version = 11 : i64} {
  func.func @_buffered_probe_kernel(%arg0: i32, %arg1: memref<8x128xf32, #tpu.memory_space<vmem>>, %arg2: memref<8x128xf32, #tpu.memory_space<vmem>>) attributes {dimension_semantics = [#tpu.dimension_semantics<arbitrary>], iteration_bounds = array<i64: 2>, scalar_prefetch = 0 : i64, scratch_operands = 0 : i64, tpu.core_type = #tpu.core_type<tc>, window_params = [{pipeline_mode = #tpu.pipeline_mode<synchronous>, transform_indices = @transform_0, window_bounds = array<i64: 8, 128>}, {transform_indices = @transform_1, window_bounds = array<i64: 8, 128>}]} {
    %c0 = arith.constant 0 : index
    %c0_0 = arith.constant 0 : index
    %0 = vector.load %arg1[%c0, %c0_0] : memref<8x128xf32, #tpu.memory_space<vmem>>, vector<8x128xf32>
    %cst = arith.constant 1.000000e+00 : f32
    %1 = vector.broadcast %cst : f32 to vector<8x128xf32>
    %2 = arith.addf %0, %1 : vector<8x128xf32>
    %c0_1 = arith.constant 0 : index
    %c0_2 = arith.constant 0 : index
    %3 = vector.load %arg2[%c0_1, %c0_2] : memref<8x128xf32, #tpu.memory_space<vmem>>, vector<8x128xf32>
    tpu.vector_store %arg2[%c0_1, %c0_2], %2 {strides = array<i32>} : memref<8x128xf32, #tpu.memory_space<vmem>>, vector<8x128xf32>,
    return
  }
  func.func @transform_0(%arg0: i32) -> (i32, i32) {
    %c0_i32 = arith.constant 0 : i32
    %c0_i32_0 = arith.constant 0 : i32
    %c0_i32_1 = arith.constant 0 : i32
    return %c0_i32, %c0_i32_0 : i32, i32
  }
  func.func @transform_1(%arg0: i32) -> (i32, i32) {
    %c0_i32 = arith.constant 0 : i32
    %c0_i32_0 = arith.constant 0 : i32
    return %arg0, %c0_i32 : i32, i32
  }
}

module attributes {stable_mosaic.version = 11 : i64} {
  func.func @_esn_fused_kernel(%arg0: i32, %arg1: i32, %arg2: memref<8x8x8xf32, #tpu.memory_space<vmem>>, %arg3: memref<8x128xf32, #tpu.memory_space<vmem>>, %arg4: memref<128x128xf32, #tpu.memory_space<vmem>>, %arg5: memref<8x128xf32, #tpu.memory_space<vmem>>, %arg6: memref<1x128xf32, #tpu.memory_space<vmem>>, %arg7: memref<128x128xf32, #tpu.memory_space<vmem>>, %arg8: memref<1x128xf32, #tpu.memory_space<vmem>>, %arg9: memref<8x8x128xf32, #tpu.memory_space<vmem>>, %arg10: memref<8x128xf32, #tpu.memory_space<vmem>>, %arg11: memref<8x128xf32, #tpu.memory_space<vmem>>) attributes {dimension_semantics = [#tpu.dimension_semantics<parallel>, #tpu.dimension_semantics<arbitrary>], iteration_bounds = array<i64: 1, 1>, scalar_prefetch = 0 : i64, scratch_operands = 1 : i64, tpu.core_type = #tpu.core_type<tc>, window_params = [{transform_indices = @transform_0, window_bounds = array<i64: 8, 8, 8>}, {transform_indices = @transform_1, window_bounds = array<i64: 8, 128>}, {pipeline_mode = #tpu.pipeline_mode<synchronous>, transform_indices = @transform_2, window_bounds = array<i64: 128, 128>}, {pipeline_mode = #tpu.pipeline_mode<synchronous>, transform_indices = @transform_3, window_bounds = array<i64: 8, 128>}, {pipeline_mode = #tpu.pipeline_mode<synchronous>, transform_indices = @transform_4, window_bounds = array<i64: 1, 128>}, {pipeline_mode = #tpu.pipeline_mode<synchronous>, transform_indices = @transform_5, window_bounds = array<i64: 128, 128>}, {pipeline_mode = #tpu.pipeline_mode<synchronous>, transform_indices = @transform_6, window_bounds = array<i64: 1, 128>}, {transform_indices = @transform_7, window_bounds = array<i64: 8, 8, 128>}, {transform_indices = @transform_8, window_bounds = array<i64: 8, 128>}]} {
    %c0_i32 = arith.constant 0 : i32
    %0 = arith.cmpi eq, %arg1, %c0_i32 : i32
    %1 = arith.extui %0 : i1 to i32
    %c0_i32_0 = arith.constant 0 : i32
    %2 = arith.cmpi ne, %1, %c0_i32_0 : i32
    scf.if %2 {
      %c0_130 = arith.constant 0 : index
      %c0_131 = arith.constant 0 : index
      %242 = vector.load %arg3[%c0_130, %c0_131] : memref<8x128xf32, #tpu.memory_space<vmem>>, vector<8x128xf32>
      %c0_132 = arith.constant 0 : index
      %c0_133 = arith.constant 0 : index
      %243 = vector.load %arg11[%c0_132, %c0_133] : memref<8x128xf32, #tpu.memory_space<vmem>>, vector<8x128xf32>
      tpu.vector_store %arg11[%c0_132, %c0_133], %242 {strides = array<i32>} : memref<8x128xf32, #tpu.memory_space<vmem>>, vector<8x128xf32>,
    } else {
    }
    %c0 = arith.constant 0 : index
    %c0_1 = arith.constant 0 : index
    %3 = vector.load %arg6[%c0, %c0_1] : memref<1x128xf32, #tpu.memory_space<vmem>>, vector<1x128xf32>
    %c0_2 = arith.constant 0 : index
    %c0_3 = arith.constant 0 : index
    %4 = vector.load %arg8[%c0_2, %c0_3] : memref<1x128xf32, #tpu.memory_space<vmem>>, vector<1x128xf32>
    %c0_4 = arith.constant 0 : index
    %c0_5 = arith.constant 0 : index
    %5 = vector.load %arg11[%c0_4, %c0_5] : memref<8x128xf32, #tpu.memory_space<vmem>>, vector<8x128xf32>
    %c0_i32_6 = arith.constant 0 : i32
    %6 = arith.index_cast %c0_i32_6 : i32 to index
    %c0_7 = arith.constant 0 : index
    %c0_8 = arith.constant 0 : index
    %7 = vector.load %arg2[%6, %c0_7, %c0_8] : memref<8x8x8xf32, #tpu.memory_space<vmem>>, vector<1x8x8xf32>
    %8 = vector.shape_cast %7 : vector<1x8x8xf32> to vector<8x8xf32>
    %c0_9 = arith.constant 0 : index
    %c0_10 = arith.constant 0 : index
    %9 = vector.load %arg5[%c0_9, %c0_10] : memref<8x128xf32, #tpu.memory_space<vmem>>, vector<8x128xf32>
    %cst = arith.constant dense<0.000000e+00> : vector<8x128xf32>
    %10 = tpu.matmul %8, %9, %cst {dimension_numbers = #tpu.dot_dimension_numbers<[1], [0], [0], [1], [0, 0, 1, 1], [], []>} : vector<8x8xf32>, vector<8x128xf32>, vector<8x128xf32> -> vector<8x128xf32>
    %11 = vector.broadcast %3 : vector<1x128xf32> to vector<8x128xf32>
    %12 = arith.addf %10, %11 : vector<8x128xf32>
    %c0_11 = arith.constant 0 : index
    %c0_12 = arith.constant 0 : index
    %13 = vector.load %arg4[%c0_11, %c0_12] : memref<128x128xf32, #tpu.memory_space<vmem>>, vector<128x128xf32>
    %cst_13 = arith.constant dense<0.000000e+00> : vector<8x128xf32>
    %14 = tpu.matmul %5, %13, %cst_13 {dimension_numbers = #tpu.dot_dimension_numbers<[1], [0], [0], [1], [0, 0, 1, 1], [], []>} : vector<8x128xf32>, vector<128x128xf32>, vector<8x128xf32> -> vector<8x128xf32>
    %15 = arith.addf %12, %14 : vector<8x128xf32>
    %16 = math.tanh %15 : vector<8x128xf32>
    %c0_14 = arith.constant 0 : index
    %c0_15 = arith.constant 0 : index
    %17 = vector.load %arg7[%c0_14, %c0_15] : memref<128x128xf32, #tpu.memory_space<vmem>>, vector<128x128xf32>
    %cst_16 = arith.constant dense<0.000000e+00> : vector<8x128xf32>
    %18 = tpu.matmul %16, %17, %cst_16 {dimension_numbers = #tpu.dot_dimension_numbers<[1], [0], [0], [1], [0, 0, 1, 1], [], []>} : vector<8x128xf32>, vector<128x128xf32>, vector<8x128xf32> -> vector<8x128xf32>
    %19 = vector.broadcast %4 : vector<1x128xf32> to vector<8x128xf32>
    %20 = arith.addf %18, %19 : vector<8x128xf32>
    %cst_17 = arith.constant dense<0xFF800000> : vector<8xf32>
    %21 = vector.multi_reduction <maximumf>, %20, %cst_17 [1] : vector<8x128xf32> to vector<8xf32>
    %22 = vector.shape_cast %21 : vector<8xf32> to vector<8x1xf32>
    %23 = vector.broadcast %22 : vector<8x1xf32> to vector<8x128xf32>
    %24 = arith.subf %20, %23 : vector<8x128xf32>
    %25 = math.exp %24 : vector<8x128xf32>
    %cst_18 = arith.constant dense<0.000000e+00> : vector<8xf32>
    %26 = vector.multi_reduction <add>, %25, %cst_18 [1] : vector<8x128xf32> to vector<8xf32>
    %27 = vector.shape_cast %26 : vector<8xf32> to vector<8x1xf32>
    %28 = tpu.reciprocal %27 {approx = true} : vector<8x1xf32> -> vector<8x1xf32>
    %29 = vector.broadcast %28 : vector<8x1xf32> to vector<8x128xf32>
    %30 = arith.mulf %25, %29 : vector<8x128xf32>
    %31 = arith.index_cast %c0_i32_6 : i32 to index
    %c0_19 = arith.constant 0 : index
    %c0_20 = arith.constant 0 : index
    %32 = vector.load %arg9[%31, %c0_19, %c0_20] : memref<8x8x128xf32, #tpu.memory_space<vmem>>, vector<1x8x128xf32>
    %33 = vector.shape_cast %32 : vector<1x8x128xf32> to vector<8x128xf32>
    %34 = vector.shape_cast %30 : vector<8x128xf32> to vector<1x8x128xf32>
    tpu.vector_store %arg9[%31, %c0_19, %c0_20], %34 {strides = array<i32>} : memref<8x8x128xf32, #tpu.memory_space<vmem>>, vector<1x8x128xf32>,
    %c1_i32 = arith.constant 1 : i32
    %35 = arith.index_cast %c1_i32 : i32 to index
    %c0_21 = arith.constant 0 : index
    %c0_22 = arith.constant 0 : index
    %36 = vector.load %arg2[%35, %c0_21, %c0_22] : memref<8x8x8xf32, #tpu.memory_space<vmem>>, vector<1x8x8xf32>
    %37 = vector.shape_cast %36 : vector<1x8x8xf32> to vector<8x8xf32>
    %c0_23 = arith.constant 0 : index
    %c0_24 = arith.constant 0 : index
    %38 = vector.load %arg5[%c0_23, %c0_24] : memref<8x128xf32, #tpu.memory_space<vmem>>, vector<8x128xf32>
    %cst_25 = arith.constant dense<0.000000e+00> : vector<8x128xf32>
    %39 = tpu.matmul %37, %38, %cst_25 {dimension_numbers = #tpu.dot_dimension_numbers<[1], [0], [0], [1], [0, 0, 1, 1], [], []>} : vector<8x8xf32>, vector<8x128xf32>, vector<8x128xf32> -> vector<8x128xf32>
    %40 = vector.broadcast %3 : vector<1x128xf32> to vector<8x128xf32>
    %41 = arith.addf %39, %40 : vector<8x128xf32>
    %c0_26 = arith.constant 0 : index
    %c0_27 = arith.constant 0 : index
    %42 = vector.load %arg4[%c0_26, %c0_27] : memref<128x128xf32, #tpu.memory_space<vmem>>, vector<128x128xf32>
    %cst_28 = arith.constant dense<0.000000e+00> : vector<8x128xf32>
    %43 = tpu.matmul %16, %42, %cst_28 {dimension_numbers = #tpu.dot_dimension_numbers<[1], [0], [0], [1], [0, 0, 1, 1], [], []>} : vector<8x128xf32>, vector<128x128xf32>, vector<8x128xf32> -> vector<8x128xf32>
    %44 = arith.addf %41, %43 : vector<8x128xf32>
    %45 = math.tanh %44 : vector<8x128xf32>
    %c0_29 = arith.constant 0 : index
    %c0_30 = arith.constant 0 : index
    %46 = vector.load %arg7[%c0_29, %c0_30] : memref<128x128xf32, #tpu.memory_space<vmem>>, vector<128x128xf32>
    %cst_31 = arith.constant dense<0.000000e+00> : vector<8x128xf32>
    %47 = tpu.matmul %45, %46, %cst_31 {dimension_numbers = #tpu.dot_dimension_numbers<[1], [0], [0], [1], [0, 0, 1, 1], [], []>} : vector<8x128xf32>, vector<128x128xf32>, vector<8x128xf32> -> vector<8x128xf32>
    %48 = vector.broadcast %4 : vector<1x128xf32> to vector<8x128xf32>
    %49 = arith.addf %47, %48 : vector<8x128xf32>
    %cst_32 = arith.constant dense<0xFF800000> : vector<8xf32>
    %50 = vector.multi_reduction <maximumf>, %49, %cst_32 [1] : vector<8x128xf32> to vector<8xf32>
    %51 = vector.shape_cast %50 : vector<8xf32> to vector<8x1xf32>
    %52 = vector.broadcast %51 : vector<8x1xf32> to vector<8x128xf32>
    %53 = arith.subf %49, %52 : vector<8x128xf32>
    %54 = math.exp %53 : vector<8x128xf32>
    %cst_33 = arith.constant dense<0.000000e+00> : vector<8xf32>
    %55 = vector.multi_reduction <add>, %54, %cst_33 [1] : vector<8x128xf32> to vector<8xf32>
    %56 = vector.shape_cast %55 : vector<8xf32> to vector<8x1xf32>
    %57 = tpu.reciprocal %56 {approx = true} : vector<8x1xf32> -> vector<8x1xf32>
    %58 = vector.broadcast %57 : vector<8x1xf32> to vector<8x128xf32>
    %59 = arith.mulf %54, %58 : vector<8x128xf32>
    %60 = arith.index_cast %c1_i32 : i32 to index
    %c0_34 = arith.constant 0 : index
    %c0_35 = arith.constant 0 : index
    %61 = vector.load %arg9[%60, %c0_34, %c0_35] : memref<8x8x128xf32, #tpu.memory_space<vmem>>, vector<1x8x128xf32>
    %62 = vector.shape_cast %61 : vector<1x8x128xf32> to vector<8x128xf32>
    %63 = vector.shape_cast %59 : vector<8x128xf32> to vector<1x8x128xf32>
    tpu.vector_store %arg9[%60, %c0_34, %c0_35], %63 {strides = array<i32>} : memref<8x8x128xf32, #tpu.memory_space<vmem>>, vector<1x8x128xf32>,
    %c2_i32 = arith.constant 2 : i32
    %64 = arith.index_cast %c2_i32 : i32 to index
    %c0_36 = arith.constant 0 : index
    %c0_37 = arith.constant 0 : index
    %65 = vector.load %arg2[%64, %c0_36, %c0_37] : memref<8x8x8xf32, #tpu.memory_space<vmem>>, vector<1x8x8xf32>
    %66 = vector.shape_cast %65 : vector<1x8x8xf32> to vector<8x8xf32>
    %c0_38 = arith.constant 0 : index
    %c0_39 = arith.constant 0 : index
    %67 = vector.load %arg5[%c0_38, %c0_39] : memref<8x128xf32, #tpu.memory_space<vmem>>, vector<8x128xf32>
    %cst_40 = arith.constant dense<0.000000e+00> : vector<8x128xf32>
    %68 = tpu.matmul %66, %67, %cst_40 {dimension_numbers = #tpu.dot_dimension_numbers<[1], [0], [0], [1], [0, 0, 1, 1], [], []>} : vector<8x8xf32>, vector<8x128xf32>, vector<8x128xf32> -> vector<8x128xf32>
    %69 = vector.broadcast %3 : vector<1x128xf32> to vector<8x128xf32>
    %70 = arith.addf %68, %69 : vector<8x128xf32>
    %c0_41 = arith.constant 0 : index
    %c0_42 = arith.constant 0 : index
    %71 = vector.load %arg4[%c0_41, %c0_42] : memref<128x128xf32, #tpu.memory_space<vmem>>, vector<128x128xf32>
    %cst_43 = arith.constant dense<0.000000e+00> : vector<8x128xf32>
    %72 = tpu.matmul %45, %71, %cst_43 {dimension_numbers = #tpu.dot_dimension_numbers<[1], [0], [0], [1], [0, 0, 1, 1], [], []>} : vector<8x128xf32>, vector<128x128xf32>, vector<8x128xf32> -> vector<8x128xf32>
    %73 = arith.addf %70, %72 : vector<8x128xf32>
    %74 = math.tanh %73 : vector<8x128xf32>
    %c0_44 = arith.constant 0 : index
    %c0_45 = arith.constant 0 : index
    %75 = vector.load %arg7[%c0_44, %c0_45] : memref<128x128xf32, #tpu.memory_space<vmem>>, vector<128x128xf32>
    %cst_46 = arith.constant dense<0.000000e+00> : vector<8x128xf32>
    %76 = tpu.matmul %74, %75, %cst_46 {dimension_numbers = #tpu.dot_dimension_numbers<[1], [0], [0], [1], [0, 0, 1, 1], [], []>} : vector<8x128xf32>, vector<128x128xf32>, vector<8x128xf32> -> vector<8x128xf32>
    %77 = vector.broadcast %4 : vector<1x128xf32> to vector<8x128xf32>
    %78 = arith.addf %76, %77 : vector<8x128xf32>
    %cst_47 = arith.constant dense<0xFF800000> : vector<8xf32>
    %79 = vector.multi_reduction <maximumf>, %78, %cst_47 [1] : vector<8x128xf32> to vector<8xf32>
    %80 = vector.shape_cast %79 : vector<8xf32> to vector<8x1xf32>
    %81 = vector.broadcast %80 : vector<8x1xf32> to vector<8x128xf32>
    %82 = arith.subf %78, %81 : vector<8x128xf32>
    %83 = math.exp %82 : vector<8x128xf32>
    %cst_48 = arith.constant dense<0.000000e+00> : vector<8xf32>
    %84 = vector.multi_reduction <add>, %83, %cst_48 [1] : vector<8x128xf32> to vector<8xf32>
    %85 = vector.shape_cast %84 : vector<8xf32> to vector<8x1xf32>
    %86 = tpu.reciprocal %85 {approx = true} : vector<8x1xf32> -> vector<8x1xf32>
    %87 = vector.broadcast %86 : vector<8x1xf32> to vector<8x128xf32>
    %88 = arith.mulf %83, %87 : vector<8x128xf32>
    %89 = arith.index_cast %c2_i32 : i32 to index
    %c0_49 = arith.constant 0 : index
    %c0_50 = arith.constant 0 : index
    %90 = vector.load %arg9[%89, %c0_49, %c0_50] : memref<8x8x128xf32, #tpu.memory_space<vmem>>, vector<1x8x128xf32>
    %91 = vector.shape_cast %90 : vector<1x8x128xf32> to vector<8x128xf32>
    %92 = vector.shape_cast %88 : vector<8x128xf32> to vector<1x8x128xf32>
    tpu.vector_store %arg9[%89, %c0_49, %c0_50], %92 {strides = array<i32>} : memref<8x8x128xf32, #tpu.memory_space<vmem>>, vector<1x8x128xf32>,
    %c3_i32 = arith.constant 3 : i32
    %93 = arith.index_cast %c3_i32 : i32 to index
    %c0_51 = arith.constant 0 : index
    %c0_52 = arith.constant 0 : index
    %94 = vector.load %arg2[%93, %c0_51, %c0_52] : memref<8x8x8xf32, #tpu.memory_space<vmem>>, vector<1x8x8xf32>
    %95 = vector.shape_cast %94 : vector<1x8x8xf32> to vector<8x8xf32>
    %c0_53 = arith.constant 0 : index
    %c0_54 = arith.constant 0 : index
    %96 = vector.load %arg5[%c0_53, %c0_54] : memref<8x128xf32, #tpu.memory_space<vmem>>, vector<8x128xf32>
    %cst_55 = arith.constant dense<0.000000e+00> : vector<8x128xf32>
    %97 = tpu.matmul %95, %96, %cst_55 {dimension_numbers = #tpu.dot_dimension_numbers<[1], [0], [0], [1], [0, 0, 1, 1], [], []>} : vector<8x8xf32>, vector<8x128xf32>, vector<8x128xf32> -> vector<8x128xf32>
    %98 = vector.broadcast %3 : vector<1x128xf32> to vector<8x128xf32>
    %99 = arith.addf %97, %98 : vector<8x128xf32>
    %c0_56 = arith.constant 0 : index
    %c0_57 = arith.constant 0 : index
    %100 = vector.load %arg4[%c0_56, %c0_57] : memref<128x128xf32, #tpu.memory_space<vmem>>, vector<128x128xf32>
    %cst_58 = arith.constant dense<0.000000e+00> : vector<8x128xf32>
    %101 = tpu.matmul %74, %100, %cst_58 {dimension_numbers = #tpu.dot_dimension_numbers<[1], [0], [0], [1], [0, 0, 1, 1], [], []>} : vector<8x128xf32>, vector<128x128xf32>, vector<8x128xf32> -> vector<8x128xf32>
    %102 = arith.addf %99, %101 : vector<8x128xf32>
    %103 = math.tanh %102 : vector<8x128xf32>
    %c0_59 = arith.constant 0 : index
    %c0_60 = arith.constant 0 : index
    %104 = vector.load %arg7[%c0_59, %c0_60] : memref<128x128xf32, #tpu.memory_space<vmem>>, vector<128x128xf32>
    %cst_61 = arith.constant dense<0.000000e+00> : vector<8x128xf32>
    %105 = tpu.matmul %103, %104, %cst_61 {dimension_numbers = #tpu.dot_dimension_numbers<[1], [0], [0], [1], [0, 0, 1, 1], [], []>} : vector<8x128xf32>, vector<128x128xf32>, vector<8x128xf32> -> vector<8x128xf32>
    %106 = vector.broadcast %4 : vector<1x128xf32> to vector<8x128xf32>
    %107 = arith.addf %105, %106 : vector<8x128xf32>
    %cst_62 = arith.constant dense<0xFF800000> : vector<8xf32>
    %108 = vector.multi_reduction <maximumf>, %107, %cst_62 [1] : vector<8x128xf32> to vector<8xf32>
    %109 = vector.shape_cast %108 : vector<8xf32> to vector<8x1xf32>
    %110 = vector.broadcast %109 : vector<8x1xf32> to vector<8x128xf32>
    %111 = arith.subf %107, %110 : vector<8x128xf32>
    %112 = math.exp %111 : vector<8x128xf32>
    %cst_63 = arith.constant dense<0.000000e+00> : vector<8xf32>
    %113 = vector.multi_reduction <add>, %112, %cst_63 [1] : vector<8x128xf32> to vector<8xf32>
    %114 = vector.shape_cast %113 : vector<8xf32> to vector<8x1xf32>
    %115 = tpu.reciprocal %114 {approx = true} : vector<8x1xf32> -> vector<8x1xf32>
    %116 = vector.broadcast %115 : vector<8x1xf32> to vector<8x128xf32>
    %117 = arith.mulf %112, %116 : vector<8x128xf32>
    %118 = arith.index_cast %c3_i32 : i32 to index
    %c0_64 = arith.constant 0 : index
    %c0_65 = arith.constant 0 : index
    %119 = vector.load %arg9[%118, %c0_64, %c0_65] : memref<8x8x128xf32, #tpu.memory_space<vmem>>, vector<1x8x128xf32>
    %120 = vector.shape_cast %119 : vector<1x8x128xf32> to vector<8x128xf32>
    %121 = vector.shape_cast %117 : vector<8x128xf32> to vector<1x8x128xf32>
    tpu.vector_store %arg9[%118, %c0_64, %c0_65], %121 {strides = array<i32>} : memref<8x8x128xf32, #tpu.memory_space<vmem>>, vector<1x8x128xf32>,
    %c4_i32 = arith.constant 4 : i32
    %122 = arith.index_cast %c4_i32 : i32 to index
    %c0_66 = arith.constant 0 : index
    %c0_67 = arith.constant 0 : index
    %123 = vector.load %arg2[%122, %c0_66, %c0_67] : memref<8x8x8xf32, #tpu.memory_space<vmem>>, vector<1x8x8xf32>
    %124 = vector.shape_cast %123 : vector<1x8x8xf32> to vector<8x8xf32>
    %c0_68 = arith.constant 0 : index
    %c0_69 = arith.constant 0 : index
    %125 = vector.load %arg5[%c0_68, %c0_69] : memref<8x128xf32, #tpu.memory_space<vmem>>, vector<8x128xf32>
    %cst_70 = arith.constant dense<0.000000e+00> : vector<8x128xf32>
    %126 = tpu.matmul %124, %125, %cst_70 {dimension_numbers = #tpu.dot_dimension_numbers<[1], [0], [0], [1], [0, 0, 1, 1], [], []>} : vector<8x8xf32>, vector<8x128xf32>, vector<8x128xf32> -> vector<8x128xf32>
    %127 = vector.broadcast %3 : vector<1x128xf32> to vector<8x128xf32>
    %128 = arith.addf %126, %127 : vector<8x128xf32>
    %c0_71 = arith.constant 0 : index
    %c0_72 = arith.constant 0 : index
    %129 = vector.load %arg4[%c0_71, %c0_72] : memref<128x128xf32, #tpu.memory_space<vmem>>, vector<128x128xf32>
    %cst_73 = arith.constant dense<0.000000e+00> : vector<8x128xf32>
    %130 = tpu.matmul %103, %129, %cst_73 {dimension_numbers = #tpu.dot_dimension_numbers<[1], [0], [0], [1], [0, 0, 1, 1], [], []>} : vector<8x128xf32>, vector<128x128xf32>, vector<8x128xf32> -> vector<8x128xf32>
    %131 = arith.addf %128, %130 : vector<8x128xf32>
    %132 = math.tanh %131 : vector<8x128xf32>
    %c0_74 = arith.constant 0 : index
    %c0_75 = arith.constant 0 : index
    %133 = vector.load %arg7[%c0_74, %c0_75] : memref<128x128xf32, #tpu.memory_space<vmem>>, vector<128x128xf32>
    %cst_76 = arith.constant dense<0.000000e+00> : vector<8x128xf32>
    %134 = tpu.matmul %132, %133, %cst_76 {dimension_numbers = #tpu.dot_dimension_numbers<[1], [0], [0], [1], [0, 0, 1, 1], [], []>} : vector<8x128xf32>, vector<128x128xf32>, vector<8x128xf32> -> vector<8x128xf32>
    %135 = vector.broadcast %4 : vector<1x128xf32> to vector<8x128xf32>
    %136 = arith.addf %134, %135 : vector<8x128xf32>
    %cst_77 = arith.constant dense<0xFF800000> : vector<8xf32>
    %137 = vector.multi_reduction <maximumf>, %136, %cst_77 [1] : vector<8x128xf32> to vector<8xf32>
    %138 = vector.shape_cast %137 : vector<8xf32> to vector<8x1xf32>
    %139 = vector.broadcast %138 : vector<8x1xf32> to vector<8x128xf32>
    %140 = arith.subf %136, %139 : vector<8x128xf32>
    %141 = math.exp %140 : vector<8x128xf32>
    %cst_78 = arith.constant dense<0.000000e+00> : vector<8xf32>
    %142 = vector.multi_reduction <add>, %141, %cst_78 [1] : vector<8x128xf32> to vector<8xf32>
    %143 = vector.shape_cast %142 : vector<8xf32> to vector<8x1xf32>
    %144 = tpu.reciprocal %143 {approx = true} : vector<8x1xf32> -> vector<8x1xf32>
    %145 = vector.broadcast %144 : vector<8x1xf32> to vector<8x128xf32>
    %146 = arith.mulf %141, %145 : vector<8x128xf32>
    %147 = arith.index_cast %c4_i32 : i32 to index
    %c0_79 = arith.constant 0 : index
    %c0_80 = arith.constant 0 : index
    %148 = vector.load %arg9[%147, %c0_79, %c0_80] : memref<8x8x128xf32, #tpu.memory_space<vmem>>, vector<1x8x128xf32>
    %149 = vector.shape_cast %148 : vector<1x8x128xf32> to vector<8x128xf32>
    %150 = vector.shape_cast %146 : vector<8x128xf32> to vector<1x8x128xf32>
    tpu.vector_store %arg9[%147, %c0_79, %c0_80], %150 {strides = array<i32>} : memref<8x8x128xf32, #tpu.memory_space<vmem>>, vector<1x8x128xf32>,
    %c5_i32 = arith.constant 5 : i32
    %151 = arith.index_cast %c5_i32 : i32 to index
    %c0_81 = arith.constant 0 : index
    %c0_82 = arith.constant 0 : index
    %152 = vector.load %arg2[%151, %c0_81, %c0_82] : memref<8x8x8xf32, #tpu.memory_space<vmem>>, vector<1x8x8xf32>
    %153 = vector.shape_cast %152 : vector<1x8x8xf32> to vector<8x8xf32>
    %c0_83 = arith.constant 0 : index
    %c0_84 = arith.constant 0 : index
    %154 = vector.load %arg5[%c0_83, %c0_84] : memref<8x128xf32, #tpu.memory_space<vmem>>, vector<8x128xf32>
    %cst_85 = arith.constant dense<0.000000e+00> : vector<8x128xf32>
    %155 = tpu.matmul %153, %154, %cst_85 {dimension_numbers = #tpu.dot_dimension_numbers<[1], [0], [0], [1], [0, 0, 1, 1], [], []>} : vector<8x8xf32>, vector<8x128xf32>, vector<8x128xf32> -> vector<8x128xf32>
    %156 = vector.broadcast %3 : vector<1x128xf32> to vector<8x128xf32>
    %157 = arith.addf %155, %156 : vector<8x128xf32>
    %c0_86 = arith.constant 0 : index
    %c0_87 = arith.constant 0 : index
    %158 = vector.load %arg4[%c0_86, %c0_87] : memref<128x128xf32, #tpu.memory_space<vmem>>, vector<128x128xf32>
    %cst_88 = arith.constant dense<0.000000e+00> : vector<8x128xf32>
    %159 = tpu.matmul %132, %158, %cst_88 {dimension_numbers = #tpu.dot_dimension_numbers<[1], [0], [0], [1], [0, 0, 1, 1], [], []>} : vector<8x128xf32>, vector<128x128xf32>, vector<8x128xf32> -> vector<8x128xf32>
    %160 = arith.addf %157, %159 : vector<8x128xf32>
    %161 = math.tanh %160 : vector<8x128xf32>
    %c0_89 = arith.constant 0 : index
    %c0_90 = arith.constant 0 : index
    %162 = vector.load %arg7[%c0_89, %c0_90] : memref<128x128xf32, #tpu.memory_space<vmem>>, vector<128x128xf32>
    %cst_91 = arith.constant dense<0.000000e+00> : vector<8x128xf32>
    %163 = tpu.matmul %161, %162, %cst_91 {dimension_numbers = #tpu.dot_dimension_numbers<[1], [0], [0], [1], [0, 0, 1, 1], [], []>} : vector<8x128xf32>, vector<128x128xf32>, vector<8x128xf32> -> vector<8x128xf32>
    %164 = vector.broadcast %4 : vector<1x128xf32> to vector<8x128xf32>
    %165 = arith.addf %163, %164 : vector<8x128xf32>
    %cst_92 = arith.constant dense<0xFF800000> : vector<8xf32>
    %166 = vector.multi_reduction <maximumf>, %165, %cst_92 [1] : vector<8x128xf32> to vector<8xf32>
    %167 = vector.shape_cast %166 : vector<8xf32> to vector<8x1xf32>
    %168 = vector.broadcast %167 : vector<8x1xf32> to vector<8x128xf32>
    %169 = arith.subf %165, %168 : vector<8x128xf32>
    %170 = math.exp %169 : vector<8x128xf32>
    %cst_93 = arith.constant dense<0.000000e+00> : vector<8xf32>
    %171 = vector.multi_reduction <add>, %170, %cst_93 [1] : vector<8x128xf32> to vector<8xf32>
    %172 = vector.shape_cast %171 : vector<8xf32> to vector<8x1xf32>
    %173 = tpu.reciprocal %172 {approx = true} : vector<8x1xf32> -> vector<8x1xf32>
    %174 = vector.broadcast %173 : vector<8x1xf32> to vector<8x128xf32>
    %175 = arith.mulf %170, %174 : vector<8x128xf32>
    %176 = arith.index_cast %c5_i32 : i32 to index
    %c0_94 = arith.constant 0 : index
    %c0_95 = arith.constant 0 : index
    %177 = vector.load %arg9[%176, %c0_94, %c0_95] : memref<8x8x128xf32, #tpu.memory_space<vmem>>, vector<1x8x128xf32>
    %178 = vector.shape_cast %177 : vector<1x8x128xf32> to vector<8x128xf32>
    %179 = vector.shape_cast %175 : vector<8x128xf32> to vector<1x8x128xf32>
    tpu.vector_store %arg9[%176, %c0_94, %c0_95], %179 {strides = array<i32>} : memref<8x8x128xf32, #tpu.memory_space<vmem>>, vector<1x8x128xf32>,
    %c6_i32 = arith.constant 6 : i32
    %180 = arith.index_cast %c6_i32 : i32 to index
    %c0_96 = arith.constant 0 : index
    %c0_97 = arith.constant 0 : index
    %181 = vector.load %arg2[%180, %c0_96, %c0_97] : memref<8x8x8xf32, #tpu.memory_space<vmem>>, vector<1x8x8xf32>
    %182 = vector.shape_cast %181 : vector<1x8x8xf32> to vector<8x8xf32>
    %c0_98 = arith.constant 0 : index
    %c0_99 = arith.constant 0 : index
    %183 = vector.load %arg5[%c0_98, %c0_99] : memref<8x128xf32, #tpu.memory_space<vmem>>, vector<8x128xf32>
    %cst_100 = arith.constant dense<0.000000e+00> : vector<8x128xf32>
    %184 = tpu.matmul %182, %183, %cst_100 {dimension_numbers = #tpu.dot_dimension_numbers<[1], [0], [0], [1], [0, 0, 1, 1], [], []>} : vector<8x8xf32>, vector<8x128xf32>, vector<8x128xf32> -> vector<8x128xf32>
    %185 = vector.broadcast %3 : vector<1x128xf32> to vector<8x128xf32>
    %186 = arith.addf %184, %185 : vector<8x128xf32>
    %c0_101 = arith.constant 0 : index
    %c0_102 = arith.constant 0 : index
    %187 = vector.load %arg4[%c0_101, %c0_102] : memref<128x128xf32, #tpu.memory_space<vmem>>, vector<128x128xf32>
    %cst_103 = arith.constant dense<0.000000e+00> : vector<8x128xf32>
    %188 = tpu.matmul %161, %187, %cst_103 {dimension_numbers = #tpu.dot_dimension_numbers<[1], [0], [0], [1], [0, 0, 1, 1], [], []>} : vector<8x128xf32>, vector<128x128xf32>, vector<8x128xf32> -> vector<8x128xf32>
    %189 = arith.addf %186, %188 : vector<8x128xf32>
    %190 = math.tanh %189 : vector<8x128xf32>
    %c0_104 = arith.constant 0 : index
    %c0_105 = arith.constant 0 : index
    %191 = vector.load %arg7[%c0_104, %c0_105] : memref<128x128xf32, #tpu.memory_space<vmem>>, vector<128x128xf32>
    %cst_106 = arith.constant dense<0.000000e+00> : vector<8x128xf32>
    %192 = tpu.matmul %190, %191, %cst_106 {dimension_numbers = #tpu.dot_dimension_numbers<[1], [0], [0], [1], [0, 0, 1, 1], [], []>} : vector<8x128xf32>, vector<128x128xf32>, vector<8x128xf32> -> vector<8x128xf32>
    %193 = vector.broadcast %4 : vector<1x128xf32> to vector<8x128xf32>
    %194 = arith.addf %192, %193 : vector<8x128xf32>
    %cst_107 = arith.constant dense<0xFF800000> : vector<8xf32>
    %195 = vector.multi_reduction <maximumf>, %194, %cst_107 [1] : vector<8x128xf32> to vector<8xf32>
    %196 = vector.shape_cast %195 : vector<8xf32> to vector<8x1xf32>
    %197 = vector.broadcast %196 : vector<8x1xf32> to vector<8x128xf32>
    %198 = arith.subf %194, %197 : vector<8x128xf32>
    %199 = math.exp %198 : vector<8x128xf32>
    %cst_108 = arith.constant dense<0.000000e+00> : vector<8xf32>
    %200 = vector.multi_reduction <add>, %199, %cst_108 [1] : vector<8x128xf32> to vector<8xf32>
    %201 = vector.shape_cast %200 : vector<8xf32> to vector<8x1xf32>
    %202 = tpu.reciprocal %201 {approx = true} : vector<8x1xf32> -> vector<8x1xf32>
    %203 = vector.broadcast %202 : vector<8x1xf32> to vector<8x128xf32>
    %204 = arith.mulf %199, %203 : vector<8x128xf32>
    %205 = arith.index_cast %c6_i32 : i32 to index
    %c0_109 = arith.constant 0 : index
    %c0_110 = arith.constant 0 : index
    %206 = vector.load %arg9[%205, %c0_109, %c0_110] : memref<8x8x128xf32, #tpu.memory_space<vmem>>, vector<1x8x128xf32>
    %207 = vector.shape_cast %206 : vector<1x8x128xf32> to vector<8x128xf32>
    %208 = vector.shape_cast %204 : vector<8x128xf32> to vector<1x8x128xf32>
    tpu.vector_store %arg9[%205, %c0_109, %c0_110], %208 {strides = array<i32>} : memref<8x8x128xf32, #tpu.memory_space<vmem>>, vector<1x8x128xf32>,
    %c7_i32 = arith.constant 7 : i32
    %209 = arith.index_cast %c7_i32 : i32 to index
    %c0_111 = arith.constant 0 : index
    %c0_112 = arith.constant 0 : index
    %210 = vector.load %arg2[%209, %c0_111, %c0_112] : memref<8x8x8xf32, #tpu.memory_space<vmem>>, vector<1x8x8xf32>
    %211 = vector.shape_cast %210 : vector<1x8x8xf32> to vector<8x8xf32>
    %c0_113 = arith.constant 0 : index
    %c0_114 = arith.constant 0 : index
    %212 = vector.load %arg5[%c0_113, %c0_114] : memref<8x128xf32, #tpu.memory_space<vmem>>, vector<8x128xf32>
    %cst_115 = arith.constant dense<0.000000e+00> : vector<8x128xf32>
    %213 = tpu.matmul %211, %212, %cst_115 {dimension_numbers = #tpu.dot_dimension_numbers<[1], [0], [0], [1], [0, 0, 1, 1], [], []>} : vector<8x8xf32>, vector<8x128xf32>, vector<8x128xf32> -> vector<8x128xf32>
    %214 = vector.broadcast %3 : vector<1x128xf32> to vector<8x128xf32>
    %215 = arith.addf %213, %214 : vector<8x128xf32>
    %c0_116 = arith.constant 0 : index
    %c0_117 = arith.constant 0 : index
    %216 = vector.load %arg4[%c0_116, %c0_117] : memref<128x128xf32, #tpu.memory_space<vmem>>, vector<128x128xf32>
    %cst_118 = arith.constant dense<0.000000e+00> : vector<8x128xf32>
    %217 = tpu.matmul %190, %216, %cst_118 {dimension_numbers = #tpu.dot_dimension_numbers<[1], [0], [0], [1], [0, 0, 1, 1], [], []>} : vector<8x128xf32>, vector<128x128xf32>, vector<8x128xf32> -> vector<8x128xf32>
    %218 = arith.addf %215, %217 : vector<8x128xf32>
    %219 = math.tanh %218 : vector<8x128xf32>
    %c0_119 = arith.constant 0 : index
    %c0_120 = arith.constant 0 : index
    %220 = vector.load %arg7[%c0_119, %c0_120] : memref<128x128xf32, #tpu.memory_space<vmem>>, vector<128x128xf32>
    %cst_121 = arith.constant dense<0.000000e+00> : vector<8x128xf32>
    %221 = tpu.matmul %219, %220, %cst_121 {dimension_numbers = #tpu.dot_dimension_numbers<[1], [0], [0], [1], [0, 0, 1, 1], [], []>} : vector<8x128xf32>, vector<128x128xf32>, vector<8x128xf32> -> vector<8x128xf32>
    %222 = vector.broadcast %4 : vector<1x128xf32> to vector<8x128xf32>
    %223 = arith.addf %221, %222 : vector<8x128xf32>
    %cst_122 = arith.constant dense<0xFF800000> : vector<8xf32>
    %224 = vector.multi_reduction <maximumf>, %223, %cst_122 [1] : vector<8x128xf32> to vector<8xf32>
    %225 = vector.shape_cast %224 : vector<8xf32> to vector<8x1xf32>
    %226 = vector.broadcast %225 : vector<8x1xf32> to vector<8x128xf32>
    %227 = arith.subf %223, %226 : vector<8x128xf32>
    %228 = math.exp %227 : vector<8x128xf32>
    %cst_123 = arith.constant dense<0.000000e+00> : vector<8xf32>
    %229 = vector.multi_reduction <add>, %228, %cst_123 [1] : vector<8x128xf32> to vector<8xf32>
    %230 = vector.shape_cast %229 : vector<8xf32> to vector<8x1xf32>
    %231 = tpu.reciprocal %230 {approx = true} : vector<8x1xf32> -> vector<8x1xf32>
    %232 = vector.broadcast %231 : vector<8x1xf32> to vector<8x128xf32>
    %233 = arith.mulf %228, %232 : vector<8x128xf32>
    %234 = arith.index_cast %c7_i32 : i32 to index
    %c0_124 = arith.constant 0 : index
    %c0_125 = arith.constant 0 : index
    %235 = vector.load %arg9[%234, %c0_124, %c0_125] : memref<8x8x128xf32, #tpu.memory_space<vmem>>, vector<1x8x128xf32>
    %236 = vector.shape_cast %235 : vector<1x8x128xf32> to vector<8x128xf32>
    %237 = vector.shape_cast %233 : vector<8x128xf32> to vector<1x8x128xf32>
    tpu.vector_store %arg9[%234, %c0_124, %c0_125], %237 {strides = array<i32>} : memref<8x8x128xf32, #tpu.memory_space<vmem>>, vector<1x8x128xf32>,
    %c8_i32 = arith.constant 8 : i32
    %c0_126 = arith.constant 0 : index
    %c0_127 = arith.constant 0 : index
    %238 = vector.load %arg11[%c0_126, %c0_127] : memref<8x128xf32, #tpu.memory_space<vmem>>, vector<8x128xf32>
    tpu.vector_store %arg11[%c0_126, %c0_127], %219 {strides = array<i32>} : memref<8x128xf32, #tpu.memory_space<vmem>>, vector<8x128xf32>,
    %c0_i32_128 = arith.constant 0 : i32
    %239 = arith.cmpi eq, %arg1, %c0_i32_128 : i32
    %240 = arith.extui %239 : i1 to i32
    %c0_i32_129 = arith.constant 0 : i32
    %241 = arith.cmpi ne, %240, %c0_i32_129 : i32
    scf.if %241 {
      %c0_130 = arith.constant 0 : index
      %c0_131 = arith.constant 0 : index
      %242 = vector.load %arg10[%c0_130, %c0_131] : memref<8x128xf32, #tpu.memory_space<vmem>>, vector<8x128xf32>
      tpu.vector_store %arg10[%c0_130, %c0_131], %219 {strides = array<i32>} : memref<8x128xf32, #tpu.memory_space<vmem>>, vector<8x128xf32>,
    } else {
    }
    return
  }
  func.func @transform_0(%arg0: i32, %arg1: i32) -> (i32, i32, i32) {
    %c0_i32 = arith.constant 0 : i32
    %c0_i32_0 = arith.constant 0 : i32
    return %arg1, %arg0, %c0_i32 : i32, i32, i32
  }
  func.func @transform_1(%arg0: i32, %arg1: i32) -> (i32, i32) {
    %c0_i32 = arith.constant 0 : i32
    %c0_i32_0 = arith.constant 0 : i32
    return %arg0, %c0_i32 : i32, i32
  }
  func.func @transform_2(%arg0: i32, %arg1: i32) -> (i32, i32) {
    %c0_i32 = arith.constant 0 : i32
    %c0_i32_0 = arith.constant 0 : i32
    %c0_i32_1 = arith.constant 0 : i32
    return %c0_i32, %c0_i32_0 : i32, i32
  }
  func.func @transform_3(%arg0: i32, %arg1: i32) -> (i32, i32) {
    %c0_i32 = arith.constant 0 : i32
    %c0_i32_0 = arith.constant 0 : i32
    %c0_i32_1 = arith.constant 0 : i32
    return %c0_i32, %c0_i32_0 : i32, i32
  }
  func.func @transform_4(%arg0: i32, %arg1: i32) -> (i32, i32) {
    %c0_i32 = arith.constant 0 : i32
    %c0_i32_0 = arith.constant 0 : i32
    %c0_i32_1 = arith.constant 0 : i32
    return %c0_i32, %c0_i32_0 : i32, i32
  }
  func.func @transform_5(%arg0: i32, %arg1: i32) -> (i32, i32) {
    %c0_i32 = arith.constant 0 : i32
    %c0_i32_0 = arith.constant 0 : i32
    %c0_i32_1 = arith.constant 0 : i32
    return %c0_i32, %c0_i32_0 : i32, i32
  }
  func.func @transform_6(%arg0: i32, %arg1: i32) -> (i32, i32) {
    %c0_i32 = arith.constant 0 : i32
    %c0_i32_0 = arith.constant 0 : i32
    %c0_i32_1 = arith.constant 0 : i32
    return %c0_i32, %c0_i32_0 : i32, i32
  }
  func.func @transform_7(%arg0: i32, %arg1: i32) -> (i32, i32, i32) {
    %c0_i32 = arith.constant 0 : i32
    %c0_i32_0 = arith.constant 0 : i32
    return %arg1, %arg0, %c0_i32 : i32, i32, i32
  }
  func.func @transform_8(%arg0: i32, %arg1: i32) -> (i32, i32) {
    %c0_i32 = arith.constant 0 : i32
    %c0_i32_0 = arith.constant 0 : i32
    return %arg0, %c0_i32 : i32, i32
  }
}

</mosaic_0001>

<bundles_post_ra>
// kernel: tpu_custom_call.1
= control target key start
LH: loop header
LB: loop body
LE: loop exit
PB: predicated region body
PF: predicated region fallthrough
CT: control target
= control target key end

     0   :  { %6 = vsyncpa [#allocation3], 0  ;;  %s448_s0 = inlined_call_operand.hbm [shape: f32[8,128], index: 0, kind: input, shape index: {}]   ;;  %s449_s1 = inlined_call_operand.hbm [shape: f32[16,128], index: 1, kind: output, shape index: {}]  }
   0x1   :  { %7 = vsyncpa [#allocation4], 0 }
   0x2   :  { %9 = vsyncpa [#allocation4 + $0x1], 0  ;;  %s348_s6 = smov 0   ;;  %s350_s7 = smov 0  }
   0x3   :  { %s352_s8 = smov 0   ;;  %s354_s9 = smov 0  }
   0x4 LB: > { %s369_s10 = sadd.s32 4294967295, %s334_s9   ;;  %s184_s11 = sadd.s32 4294967294, %s334_s9   ;;  %s334_s9 = sphi %s354_s9, %s457_s9   ;;  %s330_s8 = sphi %s352_s8, %s456_s8   ;;  %s326_s7 = sphi %s350_s7, %s455_s7   ;;  %s322_s6 = sphi %s348_s6, %s454_s6  }
   0x5   : > { %s373_s12 = sadd.s32 1, %s334_s9   ;;  %s43_s13 = sadd.s32 1, %s330_s8 }
   0x6   : > { %s40_s14 = ssub.s32 %s334_s9, %s373_s12  ;;  %p53_p0 = scmp.ne.s32.totalorder %s330_s8, %s326_s7 }
   0x7   : > { %p41_p1 = scmp.eq.s32.totalorder %s40_s14, 0  ;;  %p54_p2 = scmp.eq.s32.totalorder %s369_s10, 1 }
   0x8   : > { %p59_p3 = scmp.ne.s32.totalorder %s326_s7, %s322_s6  ;;  %p60_p4 = scmp.eq.s32.totalorder %s184_s11, 1 }
   0x9   : > { %s384_s15 = scalar_select %p41_p1, %s330_s8, %s43_s13  }
   0xa   : > { %p386_p5 = por %p54_p2, %p53_p0  ;;  %p390_p6 = por %p60_p4, %p59_p3 }
   0xb   : > { %p185_p7 = scmp.ge.s32.totalorder %s334_s9, 1  ;;  %p67_p8 = scmp.lt.s32.totalorder %s334_s9, 3 }
   0xc   : > { %s451_s17 = scalar_select %p390_p6, 1, 0 }
   0xd   : > { %p208_p9 = scmp.eq.s32.totalorder %s369_s10, 0  ;;  %p397_p10 = pnand %p185_p7, %p67_p8 }
   0xe   : > { %s336_s19 = smov [#allocation2]  }
   0xf   : > { %s80_s20 = sshll.u32 %s336_s19, 4  ;;  %p200_p11 = pneg %p397_p10  ;;  %s81_s20 = int_to_ptr.vmem [resolvable:$true] %s80_s20 }
  0x10   : > { %s255_s21 = scalar_lea.vmem %s81_s20, 128  ;;  %p263_p3 = scmp.lt.s32.totalorder %s81_s20, %s81_s20 }
  0x11   : > { %p201_p12 = pnand %p208_p9, %p200_p11  ;;  %p256_p0 = scmp.ne.s32.totalorder %s81_s20, %s255_s21 }
  0x12   : > { %p264_p4 = scmp.lt.s32.totalorder %s255_s21, %s255_s21 }
  0x13   : > { %p246_p13 = pneg %p201_p12 }
  0x14   : > { %p265_p6 = por %p264_p4, %p263_p3 }
  0x15   : > { %p258_p1 = pnand %p256_p0, %p246_p13 }
  0x17   : > { %p259_p2 = pneg %p258_p1 }
  0x19   : > { %p266_p7 = pnand %p265_p6, %p259_p2 }
  0x1b   : > { %269 = shalt.err (!%p266_p7)
}
  0x1c   : > { %203 = dma.hbm_to_vmem [thread:$0]  (!%p201_p12), %s448_s0, 128, %s81_s20, [#allocation3]  }
  0x1d   : > { %93 = sbr.rel (%p397_p10) target bundleno = 60 (0x3c), region = 24 }
  0x22   : > { %313 = dma.done.wait (%p208_p9), [#allocation3], 128  }
  0x23   : > { %315 = vsyncadd (%p208_p9), [#allocation3], 4294967168  ;;  %s105_s24 = sand.u32 1, %s326_s7   ;;  %s191_s28 = sshll.u32 %s369_s10, 7  ;;  %v108_v0 = vld [vmem:[#allocation2] sm:$0xff] }
  0x24   : > { %s189_s25 = sshll.u32 %s105_s24, 3  ;;  %v109_v1 = vadd.f32 1.0, %v108_v0  ;;  %s123_s2 = scalar_lea.hbm %s449_s1, %s191_s28 }
  0x25   : > { %s107_s26 = scalar_lea.vmem [#allocation5], %s189_s25  ;;  %s112_s3 = scalar_lea.sflag [#allocation4], %s105_s24 }
  0x26   : > { %s125_s27 = sshll.u32 %s107_s26, 4  ;;  %110 = vst [vmem:[%s107_s26] sm:$0xff] %v109_v1  ;;  %s337_s5 = smov [#allocation5]   ;;  %s126_s27 = int_to_ptr.vmem [resolvable:$true] %s125_s27 }
  0x27   : > { %s270_s4 = scalar_lea.vmem %s126_s27, 128  ;;  %s274_s11 = sshll.u32 %s337_s5, 4  ;;  %s275_s11 = int_to_ptr.vmem [resolvable:$false] %s274_s11 }
  0x28   : > { %p271_p6 = scmp.ne.s32.totalorder %s126_s27, %s270_s4  ;;  %s276_s13 = scalar_lea.vmem %s275_s11, 256 }
  0x29   : > { %p277_p10 = scmp.lt.s32.totalorder %s126_s27, %s275_s11  ;;  %p278_p11 = scmp.lt.s32.totalorder %s276_s13, %s270_s4 }
  0x2a   : > { %p272_p8 = pnand %p271_p6, %p386_p5 }
  0x2b   : > { %p279_p12 = por %p278_p11, %p277_p10 }
  0x2c   : > { %p273_p9 = pneg %p272_p8 }
  0x2e   : > { %p280_p13 = pnand %p279_p12, %p273_p9 }
  0x30   : > { %283 = shalt.err (!%p280_p13)
}
  0x31   : > { %s284_s10 = scalar_lea.hbm %s123_s2, 128  ;;  %s288_s19 = scalar_lea.hbm %s449_s1, 256 }
  0x32   : > { %p285_p0 = scmp.ne.s32.totalorder %s123_s2, %s284_s10  ;;  %p289_p3 = scmp.lt.s32.totalorder %s123_s2, %s449_s1 }
  0x33   : > { %p290_p4 = scmp.lt.s32.totalorder %s288_s19, %s284_s10 }
  0x34   : > { %p286_p1 = pnand %p285_p0, %p386_p5 }
  0x35   : > { %p291_p7 = por %p290_p4, %p289_p3 }
  0x36   : > { %p287_p2 = pneg %p286_p1 }
  0x38   : > { %p292_p6 = pnand %p291_p7, %p287_p2 }
  0x3a   : > { %295 = shalt.err (!%p292_p6)
}
  0x3b   : > { %198 = dma.vmem_to_hbm [thread:$0]  (%p386_p5), %s126_s27, 128, %s123_s2, %s112_s3  }
  0x3c PF: > { %p210_p8 = scmp.ge.s32.totalorder %s334_s9, 2  ;;  %s137_s22 = sand.u32 1, %s322_s6  }
  0x3d   : > { %p453_p9 = scmp.ne.s32.totalorder %s451_s17, 0  ;;  %s138_s23 = scalar_lea.sflag [#allocation4], %s137_s22 }
  0x3f   : > { %p205_p10 = pnand %p210_p8, %p453_p9 }
  0x41   : > { %p206_p11 = pneg %p205_p10 }
  0x43   : > { %317 = dma.done.wait (%p206_p11), %s138_s23, 128  }
  0x44   : > { %319 = vsyncadd (%p206_p11), %s138_s23, 4294967168  ;;  %p12_p12 = scmp.ge.s32.totalorder %s373_s12, 4   ;;  %s454_s6 = smov %s326_s7 }
  0x45   : > { %s455_s7 = smov %s330_s8  ;;  %s456_s8 = smov %s384_s15 }
  0x46   : > { %s457_s9 = smov %s373_s12  ;;  %14 = sbr.rel (!%p12_p12) target bundleno = 4 (0x4), region = 61 }
  0x4b   :  { %143 = vsyncpa [#allocation3], 1 }
  0x4c   :  { %145 = vsyncpa [#allocation3 + $0x1], 1 }
  0x4d   :  { %146 = vsyncpa [#allocation4], 1 }
  0x4e   :  { %148 = vsyncpa [#allocation4 + $0x1], 1 }

// kernel: tpu_custom_call.1
= control target key start
LH: loop header
LB: loop body
LE: loop exit
PB: predicated region body
PF: predicated region fallthrough
CT: control target
= control target key end

     0   :  { %14 = vsyncpa [#allocation4], 0  ;;  %s4213_s0 = inlined_call_operand.hbm [shape: f32[8,8,8], index: 0, kind: input, shape index: {}]   ;;  %s4214_s1 = inlined_call_operand.hbm [shape: f32[8,128], index: 1, kind: input, shape index: {}]   ;;  %s4215_s2 = inlined_call_operand.hbm [shape: f32[128,128], index: 2, kind: input, shape index: {}]   ;;  %s4216_s3 = inlined_call_operand.hbm [shape: f32[8,128], index: 3, kind: input, shape index: {}]   ;;  %s4217_s4 = inlined_call_operand.vmem [shape: f32[1,128], index: 4, kind: input, shape index: {}]   ;;  %s4218_s5 = inlined_call_operand.hbm [shape: f32[128,128], index: 5, kind: input, shape index: {}]   ;;  %s4219_s6 = inlined_call_operand.vmem [shape: f32[1,128], index: 6, kind: input, shape index: {}]   ;;  %s4220_s7 = inlined_call_operand.hbm [shape: f32[8,8,128], index: 7, kind: output, shape index: {0}]   ;;  %s4221_s8 = inlined_call_operand.hbm [shape: f32[8,128], index: 8, kind: output, shape index: {1}]  }
   0x1   :  { %15 = vsyncpa [#allocation7], 0 }
   0x2   :  { %16 = vsyncpa [#allocation10], 0 }
   0x3   :  { %17 = vsyncpa [#allocation5], 0 }
   0x4   :  { %18 = vsyncpa [#allocation14], 0  ;;  %s3349_s27 = smov [#allocation6]   ;;  %s3350_s29 = smov [#allocation9]  }
   0x5   :  { %s37_s28 = sshll.u32 %s3349_s27, 4  ;;  %s59_s30 = sshll.u32 %s3350_s29, 4  ;;  %s38_s28 = int_to_ptr.vmem [resolvable:$true] %s37_s28  ;;  %s60_s30 = int_to_ptr.vmem [resolvable:$true] %s59_s30 }
   0x6   :  { %s3207_s9 = scalar_lea.vmem %s38_s28, 128  ;;  %p3212_p1 = scmp.lt.s32.totalorder %s38_s28, %s38_s28 }
   0x7   :  { %p3208_p0 = scmp.ne.s32.totalorder %s38_s28, %s3207_s9  ;;  %p3213_p2 = scmp.lt.s32.totalorder %s3207_s9, %s3207_s9 }
   0x9   :  { %p3214_p3 = por %p3213_p2, %p3212_p1 }
   0xb   :  { %p3215_p4 = pnand %p3214_p3, %p3208_p0 }
   0xd   :  { %3218 = shalt.err (!%p3215_p4)
}
   0xe   :  { %40 = dma.hbm_to_vmem [thread:$0]  %s4214_s1, 128, %s38_s28, [#allocation7]  }
   0xf   :  { %s3227_s12 = scalar_lea.vmem %s60_s30, 128  ;;  %p3232_p6 = scmp.lt.s32.totalorder %s60_s30, %s60_s30 }
  0x10   :  { %p3228_p5 = scmp.ne.s32.totalorder %s60_s30, %s3227_s12  ;;  %p3233_p7 = scmp.lt.s32.totalorder %s3227_s12, %s3227_s12 }
  0x12   :  { %p3234_p8 = por %p3233_p7, %p3232_p6 }
  0x14   :  { %p3235_p9 = pnand %p3234_p8, %p3228_p5 }
  0x16   :  { %3238 = shalt.err (!%p3235_p9)
}
  0x17   :  { %62 = dma.hbm_to_vmem [thread:$0]  %s4216_s3, 128, %s60_s30, [#allocation10]  }
  0x18   :  { %s3351_s15 = smov [#allocation3]  }
  0x19   :  { %s24_s16 = sshll.u32 %s3351_s15, 4  ;;  %s25_s16 = int_to_ptr.vmem [resolvable:$true] %s24_s16 }
  0x1a   :  { %s3247_s17 = scalar_lea.vmem %s25_s16, 1024  ;;  %p3252_p11 = scmp.lt.s32.totalorder %s25_s16, %s25_s16 }
  0x1b   :  { %p3248_p10 = scmp.ne.s32.totalorder %s25_s16, %s3247_s17  ;;  %p3253_p12 = scmp.lt.s32.totalorder %s3247_s17, %s3247_s17 }
  0x1d   :  { %p3254_p13 = por %p3253_p12, %p3252_p11 }
  0x1f   :  { %p3255_p0 = pnand %p3254_p13, %p3248_p10 }
  0x21   :  { %3258 = shalt.err (!%p3255_p0)
}
  0x22   :  { %s3352_s1 = smov 128   ;;  %s3353_s18 = smov 8  }
  0x23   :  { %30 = dma.hbm_to_vmem [thread:$0]  %s4213_s0, 1024, %s25_s16, [#allocation4], %s3352_s1, %s3352_s1, %s3353_s18  }
  0x24   :  { %s3354_s3 = smov [#allocation8]   ;;  %s3355_s22 = smov [#allocation11]  }
  0x25   :  { %s46_s21 = sshll.u32 %s3354_s3, 4  ;;  %s70_s23 = sshll.u32 %s3355_s22, 4  ;;  %s47_s21 = int_to_ptr.vmem [resolvable:$true] %s46_s21  ;;  %s71_s23 = int_to_ptr.vmem [resolvable:$true] %s70_s23 }
  0x26   :  { %s3267_s24 = scalar_lea.vmem %s47_s21, 2048  ;;  %p3272_p2 = scmp.lt.s32.totalorder %s47_s21, %s47_s21 }
  0x27   :  { %p3268_p1 = scmp.ne.s32.totalorder %s47_s21, %s3267_s24  ;;  %p3273_p3 = scmp.lt.s32.totalorder %s3267_s24, %s3267_s24 }
  0x29   :  { %p3274_p4 = por %p3273_p3, %p3272_p2 }
  0x2b   :  { %p3275_p5 = pnand %p3274_p4, %p3268_p1 }
  0x2d   :  { %3278 = shalt.err (!%p3275_p5)
}
  0x2e   :  { %52 = dma.hbm_to_vmem [thread:$0]  %s4215_s2, 2048, %s47_s21, [#allocation7], %s3352_s1, %s3352_s1, %s3353_s18  }
  0x2f   :  { %s3287_s0 = scalar_lea.vmem %s71_s23, 2048  ;;  %p3292_p7 = scmp.lt.s32.totalorder %s71_s23, %s71_s23 }
  0x30   :  { %p3288_p6 = scmp.ne.s32.totalorder %s71_s23, %s3287_s0  ;;  %p3293_p8 = scmp.lt.s32.totalorder %s3287_s0, %s3287_s0 }
  0x32   :  { %p3294_p9 = por %p3293_p8, %p3292_p7 }
  0x34   :  { %p3295_p10 = pnand %p3294_p9, %p3288_p6 }
  0x36   :  { %3298 = shalt.err (!%p3295_p10)
}
  0x37   :  { %76 = dma.hbm_to_vmem [thread:$0]  %s4218_s5, 2048, %s71_s23, [#allocation10], %s3352_s1, %s3352_s1, %s3353_s18  }
  0x38   :  { %3339 = dma.done.wait [#allocation4], 1024  }
  0x39   :  { %3340 = vsyncadd [#allocation4], 4294966272 }
  0x3a   :  { %3341 = dma.done.wait [#allocation7], 2176  }
  0x3b   :  { %3342 = vsyncadd [#allocation7], 4294965120 }
  0x3c   :  { %3343 = dma.done.wait [#allocation10], 2176  }
  0x3d   :  { %3344 = vsyncadd [#allocation10], 4294965120  ;;  %v3356_v0 = vmov 0.0   ;;  %vm3357_vm0 = vmmov 0   ;;  %v3435_v1 = vld [vmem:[#allocation8 + $0x78] sm:$0xff]  ;;  %v3437_v2 = vld [vmem:[#allocation8 + $0x70] sm:$0xff] }
  0x3e   :  { %2543 = vmatprep.subr.mxu1 %v3356_v0  ;;  %2538 = vmatprep.subr.mxu0 %v3356_v0  ;;  %v3441_v3 = vld [vmem:[#allocation8 + $0x68] sm:$0xff]  ;;  %vm111_vm1 = vcmask 64512   ;;  %v3445_v4 = vld [vmem:[#allocation8 + $0x60] sm:$0xff]  ;;  %v103_v6 = vld [vmem:[#allocation3] sm:$0xff] }
  0x3f   :  { %2540 = vmatprep.mubr.msk.f32.mxu0 %vm3357_vm0, %v3356_v0  ;;  %2575 = vmatprep.mubr.msk.f32.mxu1 %vm3357_vm0, %v3356_v0  ;;  %v3447_v5 = vld [vmem:[#allocation9] sm:$0xff]  ;;  %v3452_v7 = vld [vmem:[#allocation8 + $0x58] sm:$0xff]  ;;  %v3462_v10 = vld [vmem:[#allocation8 + $0x50] sm:$0xff] }
  0x40   :  { %2544 = vmatpush3.msra.mxu1 %v3435_v1  ;;  %2539 = vmatpush3.msra.mxu0 %v3447_v5  ;;  %v3455_v8 = vld [vmem:[#allocation11 + $0x78] sm:$0xff]  ;;  %v3459_v9 = vld [vmem:[#allocation11 + $0x70] sm:$0xff]  ;;  %v3467_v11 = vld [vmem:[#allocation11 + $0x68] sm:$0xff] }
  0x41   :  { %2545 = vmatprep.subr.mxu1 %v3356_v0  ;;  %2541 = vmatmul.mubr.msk.f32.vlgmr.msra.gmra.mxu0 %vm111_vm1, %v103_v6  ;;  %v3470_v12 = vld [vmem:[#allocation8 + $0x48] sm:$0xff]  ;;  %v3478_v14 = vld [vmem:[#allocation8 + $0x40] sm:$0xff]  ;;  %v3486_v16 = vld [vmem:[#allocation8 + $0x38] sm:$0xff] }
  0x42   :  { %2546 = vmatpush3.msra.mxu1 %v3437_v2  ;;  %2578 = vmatprep.subr.mxu0 %v3356_v0  ;;  %v3475_v13 = vld [vmem:[#allocation11 + $0x60] sm:$0xff]  ;;  %v3483_v15 = vld [vmem:[#allocation11 + $0x58] sm:$0xff]  ;;  %v3491_v17 = vld [vmem:[#allocation11 + $0x50] sm:$0xff] }
  0x43   :  { %2547 = vmatprep.subr.mxu1 %v3356_v0  ;;  %2579 = vmatpush3.msra.mxu0 %v3455_v8  ;;  %v3494_v18 = vld [vmem:[#allocation8 + $0x30] sm:$0xff]  ;;  %v3500_v19 = vld [vmem:[#allocation8 + $0x28] sm:$0xff]  ;;  %v3506_v20 = vld [vmem:[#allocation8 + $0x20] sm:$0xff] }
  0x44   :  { %2548 = vmatpush3.msra.mxu1 %v3441_v3  ;;  %2580 = vmatprep.subr.mxu0 %v3356_v0  ;;  %v3512_v21 = vld [vmem:[#allocation8 + $0x18] sm:$0xff]  ;;  %v3516_v22 = vld [vmem:[#allocation8 + $0x10] sm:$0xff]  ;;  %v3520_v23 = vld [vmem:[#allocation8 + $0x8] sm:$0xff] }
  0x45   :  { %2549 = vmatprep.subr.mxu1 %v3356_v0  ;;  %2581 = vmatpush3.msra.mxu0 %v3459_v9  ;;  %v3524_v24 = vld [vmem:[#allocation8] sm:$0xff]  ;;  %v98_v25 = vld [vmem:[#allocation6] sm:$0xff]  ;;  %v3534_v26 = vld [vmem:[#allocation11 + $0x48] sm:$0xff] }
  0x46   :  { %2550 = vmatpush3.msra.mxu1 %v3445_v4  ;;  %2582 = vmatprep.subr.mxu0 %v3356_v0  ;;  %v3537_v27 = vld [vmem:[#allocation11 + $0x40] sm:$0xff]  ;;  %v3542_v28 = vld [vmem:[#allocation11 + $0x38] sm:$0xff]  ;;  %v3546_v29 = vld [vmem:[#allocation11 + $0x30] sm:$0xff] }
  0x47   :  { %2551 = vmatprep.subr.mxu1 %v3356_v0  ;;  %2583 = vmatpush3.msra.mxu0 %v3467_v11  ;;  %v3549_v30 = vld [vmem:[#allocation11 + $0x28] sm:$0xff]  ;;  %v3552_v31 = vld [vmem:[#allocation11 + $0x20] sm:$0xff]  ;;  %v3556_v32 = vld [vmem:[#allocation11 + $0x18] sm:$0xff] }
  0x48   :  { %2552 = vmatpush3.msra.mxu1 %v3452_v7  ;;  %2584 = vmatprep.subr.mxu0 %v3356_v0  ;;  %v3560_v33 = vld [vmem:[#allocation11 + $0x10] sm:$0xff]  ;;  %v3564_v34 = vld [vmem:[#allocation11 + $0x8] sm:$0xff]  ;;  %v3568_v35 = vld [vmem:[#allocation11] sm:$0xff] }
  0x49   :  { %2553 = vmatprep.subr.mxu1 %v3356_v0  ;;  %2585 = vmatpush3.msra.mxu0 %v3475_v13  ;;  %v376_v36 = vld [vmem:[#allocation3 + $0x8] sm:$0xff]  ;;  %v3612_v39 = vld [vmem:[%s4217_s4] ss:$0 sm:$0xff]  ;;  %v637_v47 = vld [vmem:[#allocation3 + $0x10] sm:$0xff] }
  0x4a   :  { %2554 = vmatpush3.msra.mxu1 %v3462_v10  ;;  %2586 = vmatprep.subr.mxu0 %v3356_v0  ;;  %v3691_v48 = vld [vmem:[%s4219_s6] ss:$0 sm:$0xff]  ;;  %v898_v59 = vld [vmem:[#allocation3 + $0x18] sm:$0xff] }
  0x4b   :  { %2555 = vmatprep.subr.mxu1 %v3356_v0  ;;  %2587 = vmatpush3.msra.mxu0 %v3483_v15 }
  0x4c   :  { %2556 = vmatpush3.msra.mxu1 %v3470_v12  ;;  %2588 = vmatprep.subr.mxu0 %v3356_v0 }
  0x4d   :  { %2557 = vmatprep.subr.mxu1 %v3356_v0  ;;  %2589 = vmatpush3.msra.mxu0 %v3491_v17 }
  0x4e   :  { %2558 = vmatpush3.msra.mxu1 %v3478_v14  ;;  %2590 = vmatprep.subr.mxu0 %v3356_v0 }
  0x4f   :  { %2559 = vmatprep.subr.mxu1 %v3356_v0  ;;  %2610 = vmatprep.mubr.msk.f32.mxu0 %vm3357_vm0, %v3356_v0 }
  0x50   :  { %2560 = vmatpush3.msra.mxu1 %v3486_v16  ;;  %2591 = vmatpush3.msra.mxu0 %v3534_v26 }
  0x51   :  { %2561 = vmatprep.subr.mxu1 %v3356_v0  ;;  %2592 = vmatprep.subr.mxu0 %v3356_v0 }
  0x52   :  { %2562 = vmatpush3.msra.mxu1 %v3494_v18  ;;  %2593 = vmatpush3.msra.mxu0 %v3537_v27 }
  0x53   :  { %2563 = vmatprep.subr.mxu1 %v3356_v0  ;;  %2594 = vmatprep.subr.mxu0 %v3356_v0 }
  0x54   :  { %2564 = vmatpush3.msra.mxu1 %v3500_v19  ;;  %2595 = vmatpush3.msra.mxu0 %v3542_v28 }
  0x55   :  { %2565 = vmatprep.subr.mxu1 %v3356_v0  ;;  %2596 = vmatprep.subr.mxu0 %v3356_v0 }
  0x56   :  { %2566 = vmatpush3.msra.mxu1 %v3506_v20  ;;  %2597 = vmatpush3.msra.mxu0 %v3546_v29 }
  0x57   :  { %2567 = vmatprep.subr.mxu1 %v3356_v0  ;;  %2598 = vmatprep.subr.mxu0 %v3356_v0 }
  0x58   :  { %2568 = vmatpush3.msra.mxu1 %v3512_v21  ;;  %2599 = vmatpush3.msra.mxu0 %v3549_v30 }
  0x59   :  { %2569 = vmatprep.subr.mxu1 %v3356_v0  ;;  %2600 = vmatprep.subr.mxu0 %v3356_v0 }
  0x5a   :  { %2570 = vmatpush3.msra.mxu1 %v3516_v22  ;;  %2601 = vmatpush3.msra.mxu0 %v3552_v31 }
  0x5b   :  { %2571 = vmatprep.subr.mxu1 %v3356_v0  ;;  %2602 = vmatprep.subr.mxu0 %v3356_v0 }
  0x5c   :  { %2572 = vmatpush3.msra.mxu1 %v3520_v23  ;;  %2603 = vmatpush3.msra.mxu0 %v3556_v32 }
  0x5d   :  { %2573 = vmatprep.subr.mxu1 %v3356_v0  ;;  %2604 = vmatprep.subr.mxu0 %v3356_v0 }
  0x5e   :  { %2574 = vmatpush3.msra.mxu1 %v3524_v24  ;;  %2605 = vmatpush3.msra.mxu0 %v3560_v33 }
  0x5f   :  { %2576 = vmatmul.mubr.f32.vlgmr.msra.gmra.mxu1 %v98_v25  ;;  %2613 = vmatprep.subr.mxu1 %v3356_v0 }
  0x60   :  { %2614 = vmatpush3.msra.mxu1 %v3447_v5  ;;  %2615 = vmatprep.mubr.msk.f32.mxu1 %vm3357_vm0, %v3356_v0 }
  0x61   :  { %2653 = vmatprep.subr.mxu1 %v3356_v0  ;;  %2606 = vmatprep.subr.mxu0 %v3356_v0 }
  0x62   :  { %2607 = vmatpush3.msra.mxu0 %v3564_v34 }
  0x63   :  { %2608 = vmatprep.subr.mxu0 %v3356_v0  ;;  %2616 = vmatmul.mubr.msk.f32.vlgmr.msra.gmra.mxu1 %vm111_vm1, %v376_v36 }
  0x64   :  { %2609 = vmatpush3.msra.mxu0 %v3568_v35  ;;  %2654 = vmatpush3.msra.mxu1 %v3455_v8 }
  0x65   :  { %2618 = vmatprep.subr.mxu0 %v3356_v0  ;;  %2685 = vmatprep.mubr.msk.f32.mxu1 %vm3357_vm0, %v3356_v0 }
  0x66   :  { %2655 = vmatprep.subr.mxu1 %v3356_v0 }
  0x67   :  { %2656 = vmatpush3.msra.mxu1 %v3459_v9 }
  0x68   :  { %2657 = vmatprep.subr.mxu1 %v3356_v0 }
  0x69   :  { %2658 = vmatpush3.msra.mxu1 %v3467_v11 }
  0x6a   :  { %2659 = vmatprep.subr.mxu1 %v3356_v0 }
  0x6b   :  { %2660 = vmatpush3.msra.mxu1 %v3475_v13 }
  0x6c   :  { %2661 = vmatprep.subr.mxu1 %v3356_v0 }
  0x6d   :  { %2662 = vmatpush3.msra.mxu1 %v3483_v15 }
  0x6e   :  { %2663 = vmatprep.subr.mxu1 %v3356_v0 }
  0x6f   :  { %2664 = vmatpush3.msra.mxu1 %v3491_v17 }
  0x70   :  { %2665 = vmatprep.subr.mxu1 %v3356_v0 }
  0x71   :  { %2666 = vmatpush3.msra.mxu1 %v3534_v26 }
  0x72   :  { %2667 = vmatprep.subr.mxu1 %v3356_v0 }
  0x73   :  { %2668 = vmatpush3.msra.mxu1 %v3537_v27 }
  0x74   :  { %2669 = vmatprep.subr.mxu1 %v3356_v0 }
  0x75   :  { %2670 = vmatpush3.msra.mxu1 %v3542_v28 }
  0x76   :  { %2671 = vmatprep.subr.mxu1 %v3356_v0 }
  0x77   :  { %2672 = vmatpush3.msra.mxu1 %v3546_v29 }
  0x78   :  { %2673 = vmatprep.subr.mxu1 %v3356_v0 }
  0x79   :  { %2674 = vmatpush3.msra.mxu1 %v3549_v30 }
  0x7a   :  { %2675 = vmatprep.subr.mxu1 %v3356_v0 }
  0x7b   :  { %2676 = vmatpush3.msra.mxu1 %v3552_v31 }
  0x7c   :  { %2677 = vmatprep.subr.mxu1 %v3356_v0 }
  0x7d   :  { %2678 = vmatpush3.msra.mxu1 %v3556_v32 }
  0x7e   :  { %2679 = vmatprep.subr.mxu1 %v3356_v0 }
  0x7f   :  { %2680 = vmatpush3.msra.mxu1 %v3560_v33 }
  0x80   :  { %2681 = vmatprep.subr.mxu1 %v3356_v0 }
  0x81   :  { %2682 = vmatpush3.msra.mxu1 %v3564_v34 }
  0x82   :  { %2683 = vmatprep.subr.mxu1 %v3356_v0 }
  0x83   :  { %2684 = vmatpush3.msra.mxu1 %v3568_v35 }
  0x84   :  { %2693 = vmatprep.subr.mxu1 %v3356_v0 }
 0x101   :  { %v181_v37 = vpop.f32.mrf.mxu0 }
 0x102   :  { %v182_v40 = vadd.f32 %v3612_v39, %v181_v37 }
 0x103   :  { %v2542_v38 = vpop.f32.mrf.mxu0 }
 0x11f   :  { %v267_v41 = vpop.f32.mrf.mxu1 }
 0x120   :  { %v271_v42 = vadd.f32 %v267_v41, %v182_v40  ;;  %v1159_v41 = vld [vmem:[#allocation3 + $0x20] sm:$0xff] }
 0x121   :  { %v2577_v43 = vpop.f32.mrf.mxu1 }
 0x122   :  { %3149 = vtanh.f32 %v271_v42  ;;  %v3954_v42 = vld [vmem:[#allocation8 + $0x10] sm:$0xff]  ;;  %v3958_v43 = vld [vmem:[#allocation8 + $0x8] sm:$0xff] }
 0x123   :  { %v447_v45 = vpop.f32.mrf.mxu1 }
 0x124   :  { %v448_v52 = vadd.f32 %v3612_v39, %v447_v45  ;;  %v3972_v45 = vld [vmem:[#allocation11 + $0x78] sm:$0xff] }
 0x125   :  { %v2617_v46 = vpop.f32.mrf.mxu1 }
 0x126   :  { %v3974_v46 = vld [vmem:[#allocation11 + $0x70] sm:$0xff] }
 0x12f   :  { %v3150_v44 = vpop.eup %3149 }
 0x130   :  { %2611 = vmatmul.mubr.f32.vlgmr.msra.gmra.mxu0 %v3150_v44 }
 0x131   :  { %2619 = vmatpush3.msra.mxu0 %v3435_v1  ;;  %2650 = vmatprep.mubr.msk.f32.mxu0 %vm3357_vm0, %v3356_v0 }
 0x132   :  { %2620 = vmatprep.subr.mxu0 %v3356_v0 }
 0x133   :  { %2621 = vmatpush3.msra.mxu0 %v3437_v2 }
 0x134   :  { %2622 = vmatprep.subr.mxu0 %v3356_v0 }
 0x135   :  { %2623 = vmatpush3.msra.mxu0 %v3441_v3 }
 0x136   :  { %2624 = vmatprep.subr.mxu0 %v3356_v0 }
 0x137   :  { %2625 = vmatpush3.msra.mxu0 %v3445_v4 }
 0x138   :  { %2626 = vmatprep.subr.mxu0 %v3356_v0 }
 0x139   :  { %2627 = vmatpush3.msra.mxu0 %v3452_v7 }
 0x13a   :  { %2628 = vmatprep.subr.mxu0 %v3356_v0 }
 0x13b   :  { %2629 = vmatpush3.msra.mxu0 %v3462_v10 }
 0x13c   :  { %2630 = vmatprep.subr.mxu0 %v3356_v0 }
 0x13d   :  { %2631 = vmatpush3.msra.mxu0 %v3470_v12 }
 0x13e   :  { %2632 = vmatprep.subr.mxu0 %v3356_v0 }
 0x13f   :  { %2633 = vmatpush3.msra.mxu0 %v3478_v14 }
 0x140   :  { %2634 = vmatprep.subr.mxu0 %v3356_v0 }
 0x141   :  { %2635 = vmatpush3.msra.mxu0 %v3486_v16 }
 0x142   :  { %2636 = vmatprep.subr.mxu0 %v3356_v0 }
 0x143   :  { %2637 = vmatpush3.msra.mxu0 %v3494_v18 }
 0x144   :  { %2638 = vmatprep.subr.mxu0 %v3356_v0 }
 0x145   :  { %2639 = vmatpush3.msra.mxu0 %v3500_v19 }
 0x146   :  { %2640 = vmatprep.subr.mxu0 %v3356_v0 }
 0x147   :  { %2641 = vmatpush3.msra.mxu0 %v3506_v20 }
 0x148   :  { %2642 = vmatprep.subr.mxu0 %v3356_v0 }
 0x149   :  { %2643 = vmatpush3.msra.mxu0 %v3512_v21 }
 0x14a   :  { %2644 = vmatprep.subr.mxu0 %v3356_v0 }
 0x14b   :  { %2645 = vmatpush3.msra.mxu0 %v3516_v22 }
 0x14c   :  { %2646 = vmatprep.subr.mxu0 %v3356_v0 }
 0x14d   :  { %2647 = vmatpush3.msra.mxu0 %v3520_v23 }
 0x14e   :  { %2648 = vmatprep.subr.mxu0 %v3356_v0 }
 0x14f   :  { %2649 = vmatpush3.msra.mxu0 %v3524_v24 }
 0x150   :  { %2651 = vmatmul.mubr.f32.vlgmr.msra.gmra.mxu0 %v3150_v44  ;;  %2688 = vmatprep.subr.mxu0 %v3356_v0  ;;  %v3962_v44 = vld [vmem:[#allocation8] sm:$0xff] }
 0x151   :  { %2689 = vmatpush3.msra.mxu0 %v3447_v5  ;;  %2690 = vmatprep.mubr.msk.f32.mxu0 %vm3357_vm0, %v3356_v0 }
 0x152   :  { %2728 = vmatprep.subr.mxu0 %v3356_v0 }
 0x154   :  { %2691 = vmatmul.mubr.msk.f32.vlgmr.msra.gmra.mxu0 %vm111_vm1, %v637_v47  ;;  %v3978_v47 = vld [vmem:[#allocation11 + $0x68] sm:$0xff] }
 0x155   :  { %2729 = vmatpush3.msra.mxu0 %v3455_v8  ;;  %2760 = vmatprep.mubr.msk.f32.mxu0 %vm3357_vm0, %v3356_v0 }
 0x156   :  { %2730 = vmatprep.subr.mxu0 %v3356_v0 }
 0x157   :  { %2731 = vmatpush3.msra.mxu0 %v3459_v9 }
 0x158   :  { %2732 = vmatprep.subr.mxu0 %v3356_v0 }
 0x159   :  { %2733 = vmatpush3.msra.mxu0 %v3467_v11 }
 0x15a   :  { %2734 = vmatprep.subr.mxu0 %v3356_v0 }
 0x15b   :  { %2735 = vmatpush3.msra.mxu0 %v3475_v13 }
 0x15c   :  { %2736 = vmatprep.subr.mxu0 %v3356_v0 }
 0x15d   :  { %2737 = vmatpush3.msra.mxu0 %v3483_v15 }
 0x15e   :  { %2738 = vmatprep.subr.mxu0 %v3356_v0 }
 0x15f   :  { %2739 = vmatpush3.msra.mxu0 %v3491_v17 }
 0x160   :  { %2740 = vmatprep.subr.mxu0 %v3356_v0 }
 0x161   :  { %2741 = vmatpush3.msra.mxu0 %v3534_v26 }
 0x162   :  { %2742 = vmatprep.subr.mxu0 %v3356_v0 }
 0x163   :  { %2743 = vmatpush3.msra.mxu0 %v3537_v27 }
 0x164   :  { %2744 = vmatprep.subr.mxu0 %v3356_v0 }
 0x165   :  { %2745 = vmatpush3.msra.mxu0 %v3542_v28 }
 0x166   :  { %2746 = vmatprep.subr.mxu0 %v3356_v0 }
 0x167   :  { %2747 = vmatpush3.msra.mxu0 %v3546_v29 }
 0x168   :  { %2748 = vmatprep.subr.mxu0 %v3356_v0 }
 0x169   :  { %2749 = vmatpush3.msra.mxu0 %v3549_v30 }
 0x16a   :  { %2750 = vmatprep.subr.mxu0 %v3356_v0 }
 0x16b   :  { %2751 = vmatpush3.msra.mxu0 %v3552_v31 }
 0x16c   :  { %2752 = vmatprep.subr.mxu0 %v3356_v0 }
 0x16d   :  { %2753 = vmatpush3.msra.mxu0 %v3556_v32 }
 0x16e   :  { %2754 = vmatprep.subr.mxu0 %v3356_v0 }
 0x16f   :  { %2755 = vmatpush3.msra.mxu0 %v3560_v33 }
 0x170   :  { %2756 = vmatprep.subr.mxu0 %v3356_v0 }
 0x171   :  { %2757 = vmatpush3.msra.mxu0 %v3564_v34 }
 0x172   :  { %2758 = vmatprep.subr.mxu0 %v3356_v0 }
 0x173   :  { %2759 = vmatpush3.msra.mxu0 %v3568_v35 }
 0x174   :  { %2768 = vmatprep.subr.mxu0 %v3356_v0 }
 0x1f0   :  { %v361_v49 = vpop.f32.mrf.mxu0 }
 0x1f1   :  { %v3694_v50 = vadd.f32 %v3691_v48, %v361_v49  ;;  %v3982_v49 = vld [vmem:[#allocation11 + $0x60] sm:$0xff] }
 0x1f2   :  { %v2612_v51 = vpop.f32.mrf.mxu0 }
 0x1f3   :  { %365 = vmax.xlane.f32.xlu0 %v3694_v50  ;;  %v3986_v51 = vld [vmem:[#allocation11 + $0x58] sm:$0xff] }
 0x210   :  { %v533_v53 = vpop.f32.mrf.mxu0 }
 0x211   :  { %v537_v54 = vadd.f32 %v533_v53, %v448_v52  ;;  %v3990_v52 = vld [vmem:[#allocation11 + $0x50] sm:$0xff]  ;;  %v3994_v53 = vld [vmem:[#allocation11 + $0x48] sm:$0xff] }
 0x212   :  { %v2652_v55 = vpop.f32.mrf.mxu0 }
 0x213   :  { %3151 = vtanh.f32 %v537_v54  ;;  %v3998_v54 = vld [vmem:[#allocation11 + $0x40] sm:$0xff] }
 0x214   :  { %v708_v57 = vpop.f32.mrf.mxu0 }
 0x215   :  { %v709_v63 = vadd.f32 %v3612_v39, %v708_v57  ;;  %v4006_v57 = vld [vmem:[#allocation11 + $0x38] sm:$0xff] }
 0x216   :  { %v2692_v58 = vpop.f32.mrf.mxu0 }
 0x217   :  { %v4010_v58 = vld [vmem:[#allocation11 + $0x30] sm:$0xff] }
 0x220   :  { %v3152_v56 = vpop.eup %3151 }
 0x221   :  { %2686 = vmatmul.mubr.f32.vlgmr.msra.gmra.mxu1 %v3152_v56 }
 0x222   :  { %2694 = vmatpush3.msra.mxu1 %v3435_v1  ;;  %2725 = vmatprep.mubr.msk.f32.mxu1 %vm3357_vm0, %v3356_v0 }
 0x223   :  { %2695 = vmatprep.subr.mxu1 %v3356_v0 }
 0x224   :  { %2696 = vmatpush3.msra.mxu1 %v3437_v2 }
 0x225   :  { %2697 = vmatprep.subr.mxu1 %v3356_v0 }
 0x226   :  { %2698 = vmatpush3.msra.mxu1 %v3441_v3 }
 0x227   :  { %2699 = vmatprep.subr.mxu1 %v3356_v0 }
 0x228   :  { %2700 = vmatpush3.msra.mxu1 %v3445_v4 }
 0x229   :  { %2701 = vmatprep.subr.mxu1 %v3356_v0 }
 0x22a   :  { %2702 = vmatpush3.msra.mxu1 %v3452_v7 }
 0x22b   :  { %2703 = vmatprep.subr.mxu1 %v3356_v0 }
 0x22c   :  { %2704 = vmatpush3.msra.mxu1 %v3462_v10 }
 0x22d   :  { %2705 = vmatprep.subr.mxu1 %v3356_v0 }
 0x22e   :  { %2706 = vmatpush3.msra.mxu1 %v3470_v12 }
 0x22f   :  { %2707 = vmatprep.subr.mxu1 %v3356_v0 }
 0x230   :  { %2708 = vmatpush3.msra.mxu1 %v3478_v14 }
 0x231   :  { %2709 = vmatprep.subr.mxu1 %v3356_v0 }
 0x232   :  { %2710 = vmatpush3.msra.mxu1 %v3486_v16 }
 0x233   :  { %2711 = vmatprep.subr.mxu1 %v3356_v0 }
 0x234   :  { %2712 = vmatpush3.msra.mxu1 %v3494_v18 }
 0x235   :  { %2713 = vmatprep.subr.mxu1 %v3356_v0 }
 0x236   :  { %2714 = vmatpush3.msra.mxu1 %v3500_v19 }
 0x237   :  { %2715 = vmatprep.subr.mxu1 %v3356_v0 }
 0x238   :  { %2716 = vmatpush3.msra.mxu1 %v3506_v20 }
 0x239   :  { %2717 = vmatprep.subr.mxu1 %v3356_v0 }
 0x23a   :  { %2718 = vmatpush3.msra.mxu1 %v3512_v21 }
 0x23b   :  { %2719 = vmatprep.subr.mxu1 %v3356_v0 }
 0x23c   :  { %2720 = vmatpush3.msra.mxu1 %v3516_v22 }
 0x23d   :  { %2721 = vmatprep.subr.mxu1 %v3356_v0 }
 0x23e   :  { %2722 = vmatpush3.msra.mxu1 %v3520_v23 }
 0x23f   :  { %2723 = vmatprep.subr.mxu1 %v3356_v0 }
 0x240   :  { %2724 = vmatpush3.msra.mxu1 %v3524_v24 }
 0x241   :  { %2726 = vmatmul.mubr.f32.vlgmr.msra.gmra.mxu1 %v3152_v56  ;;  %2763 = vmatprep.subr.mxu1 %v3356_v0 }
 0x242   :  { %2764 = vmatpush3.msra.mxu1 %v3447_v5  ;;  %2765 = vmatprep.mubr.msk.f32.mxu1 %vm3357_vm0, %v3356_v0 }
 0x243   :  { %2803 = vmatprep.subr.mxu1 %v3356_v0 }
 0x245   :  { %2766 = vmatmul.mubr.msk.f32.vlgmr.msra.gmra.mxu1 %vm111_vm1, %v898_v59  ;;  %v4013_v59 = vld [vmem:[#allocation11 + $0x28] sm:$0xff] }
 0x246   :  { %2804 = vmatpush3.msra.mxu1 %v3455_v8  ;;  %2835 = vmatprep.mubr.msk.f32.mxu1 %vm3357_vm0, %v3356_v0 }
 0x247   :  { %2805 = vmatprep.subr.mxu1 %v3356_v0 }
 0x248   :  { %2806 = vmatpush3.msra.mxu1 %v3459_v9 }
 0x249   :  { %2807 = vmatprep.subr.mxu1 %v3356_v0 }
 0x24a   :  { %2808 = vmatpush3.msra.mxu1 %v3467_v11 }
 0x24b   :  { %2809 = vmatprep.subr.mxu1 %v3356_v0 }
 0x24c   :  { %2810 = vmatpush3.msra.mxu1 %v3475_v13 }
 0x24d   :  { %2811 = vmatprep.subr.mxu1 %v3356_v0 }
 0x24e   :  { %2812 = vmatpush3.msra.mxu1 %v3483_v15 }
 0x24f   :  { %2813 = vmatprep.subr.mxu1 %v3356_v0 }
 0x250   :  { %2814 = vmatpush3.msra.mxu1 %v3491_v17 }
 0x251   :  { %2815 = vmatprep.subr.mxu1 %v3356_v0 }
 0x252   :  { %2816 = vmatpush3.msra.mxu1 %v3534_v26 }
 0x253   :  { %2817 = vmatprep.subr.mxu1 %v3356_v0 }
 0x254   :  { %2818 = vmatpush3.msra.mxu1 %v3537_v27 }
 0x255   :  { %2819 = vmatprep.subr.mxu1 %v3356_v0 }
 0x256   :  { %2820 = vmatpush3.msra.mxu1 %v3542_v28 }
 0x257   :  { %2821 = vmatprep.subr.mxu1 %v3356_v0 }
 0x258   :  { %2822 = vmatpush3.msra.mxu1 %v3546_v29 }
 0x259   :  { %2823 = vmatprep.subr.mxu1 %v3356_v0 }
 0x25a   :  { %2824 = vmatpush3.msra.mxu1 %v3549_v30 }
 0x25b   :  { %2825 = vmatprep.subr.mxu1 %v3356_v0 }
 0x25c   :  { %2826 = vmatpush3.msra.mxu1 %v3552_v31 }
 0x25d   :  { %2827 = vmatprep.subr.mxu1 %v3356_v0 }
 0x25e   :  { %2828 = vmatpush3.msra.mxu1 %v3556_v32 }
 0x25f   :  { %2829 = vmatprep.subr.mxu1 %v3356_v0 }
 0x260   :  { %2830 = vmatpush3.msra.mxu1 %v3560_v33 }
 0x261   :  { %2831 = vmatprep.subr.mxu1 %v3356_v0 }
 0x262   :  { %2832 = vmatpush3.msra.mxu1 %v3564_v34 }
 0x263   :  { %2833 = vmatprep.subr.mxu1 %v3356_v0 }
 0x264   :  { %2834 = vmatpush3.msra.mxu1 %v3568_v35 }
 0x265   :  { %2843 = vmatprep.subr.mxu1 %v3356_v0 }
 0x2e1   :  { %v621_v60 = vpop.f32.mrf.mxu1 }
 0x2e2   :  { %v3772_v61 = vadd.f32 %v3691_v48, %v621_v60  ;;  %v4016_v60 = vld [vmem:[#allocation11 + $0x20] sm:$0xff] }
 0x2e3   :  { %v2687_v62 = vpop.f32.mrf.mxu1 }
 0x2e4   :  { %625 = vmax.xlane.f32.xlu0 %v3772_v61  ;;  %v4020_v62 = vld [vmem:[#allocation11 + $0x18] sm:$0xff] }
 0x301   :  { %v794_v6 = vpop.f32.mrf.mxu1 }
 0x302   :  { %v798_v25 = vadd.f32 %v794_v6, %v709_v63  ;;  %v4024_v63 = vld [vmem:[#allocation11 + $0x10] sm:$0xff]  ;;  %v4028_v6 = vld [vmem:[#allocation11 + $0x8] sm:$0xff] }
 0x303   :  { %v2727_v36 = vpop.f32.mrf.mxu1 }
 0x304   :  { %3153 = vtanh.f32 %v798_v25  ;;  %v4032_v25 = vld [vmem:[#allocation11] sm:$0xff] }
 0x305   :  { %v969_v38 = vpop.f32.mrf.mxu1  ;;  %v1681_v36 = vld [vmem:[#allocation3 + $0x30] sm:$0xff] }
 0x307   :  { %v2767_v40 = vpop.f32.mrf.mxu1 }
 0x311   :  { %v3154_v37 = vpop.eup %3153 }
 0x312   :  { %2761 = vmatmul.mubr.f32.vlgmr.msra.gmra.mxu0 %v3154_v37 }
 0x313   :  { %2769 = vmatpush3.msra.mxu0 %v3435_v1  ;;  %2800 = vmatprep.mubr.msk.f32.mxu0 %vm3357_vm0, %v3356_v0 }
 0x314   :  { %2770 = vmatprep.subr.mxu0 %v3356_v0 }
 0x315   :  { %2771 = vmatpush3.msra.mxu0 %v3437_v2 }
 0x316   :  { %2772 = vmatprep.subr.mxu0 %v3356_v0 }
 0x317   :  { %2773 = vmatpush3.msra.mxu0 %v3441_v3 }
 0x318   :  { %2774 = vmatprep.subr.mxu0 %v3356_v0 }
 0x319   :  { %2775 = vmatpush3.msra.mxu0 %v3445_v4 }
 0x31a   :  { %2776 = vmatprep.subr.mxu0 %v3356_v0 }
 0x31b   :  { %2777 = vmatpush3.msra.mxu0 %v3452_v7 }
 0x31c   :  { %2778 = vmatprep.subr.mxu0 %v3356_v0 }
 0x31d   :  { %2779 = vmatpush3.msra.mxu0 %v3462_v10 }
 0x31e   :  { %2780 = vmatprep.subr.mxu0 %v3356_v0 }
 0x31f   :  { %2781 = vmatpush3.msra.mxu0 %v3470_v12 }
 0x320   :  { %2782 = vmatprep.subr.mxu0 %v3356_v0 }
 0x321   :  { %2783 = vmatpush3.msra.mxu0 %v3478_v14 }
 0x322   :  { %2784 = vmatprep.subr.mxu0 %v3356_v0 }
 0x323   :  { %2785 = vmatpush3.msra.mxu0 %v3486_v16 }
 0x324   :  { %2786 = vmatprep.subr.mxu0 %v3356_v0 }
 0x325   :  { %2787 = vmatpush3.msra.mxu0 %v3494_v18 }
 0x326   :  { %2788 = vmatprep.subr.mxu0 %v3356_v0 }
 0x327   :  { %2789 = vmatpush3.msra.mxu0 %v3500_v19 }
 0x328   :  { %2790 = vmatprep.subr.mxu0 %v3356_v0 }
 0x329   :  { %2791 = vmatpush3.msra.mxu0 %v3506_v20 }
 0x32a   :  { %2792 = vmatprep.subr.mxu0 %v3356_v0 }
 0x32b   :  { %2793 = vmatpush3.msra.mxu0 %v3512_v21 }
 0x32c   :  { %2794 = vmatprep.subr.mxu0 %v3356_v0 }
 0x32d   :  { %2795 = vmatpush3.msra.mxu0 %v3516_v22 }
 0x32e   :  { %2796 = vmatprep.subr.mxu0 %v3356_v0 }
 0x32f   :  { %2797 = vmatpush3.msra.mxu0 %v3520_v23 }
 0x330   :  { %2798 = vmatprep.subr.mxu0 %v3356_v0 }
 0x331   :  { %2799 = vmatpush3.msra.mxu0 %v3524_v24 }
 0x332   :  { %2801 = vmatmul.mubr.f32.vlgmr.msra.gmra.mxu0 %v3154_v37  ;;  %2838 = vmatprep.subr.mxu0 %v3356_v0 }
 0x333   :  { %2839 = vmatpush3.msra.mxu0 %v3447_v5  ;;  %2840 = vmatprep.mubr.msk.f32.mxu0 %vm3357_vm0, %v3356_v0 }
 0x334   :  { %2878 = vmatprep.subr.mxu0 %v3356_v0 }
 0x336   :  { %2841 = vmatmul.mubr.msk.f32.vlgmr.msra.gmra.mxu0 %vm111_vm1, %v1159_v41 }
 0x337   :  { %2879 = vmatpush3.msra.mxu0 %v3455_v8  ;;  %2910 = vmatprep.mubr.msk.f32.mxu0 %vm3357_vm0, %v3356_v0 }
 0x338   :  { %2880 = vmatprep.subr.mxu0 %v3356_v0 }
 0x339   :  { %2881 = vmatpush3.msra.mxu0 %v3459_v9 }
 0x33a   :  { %2882 = vmatprep.subr.mxu0 %v3356_v0 }
 0x33b   :  { %2883 = vmatpush3.msra.mxu0 %v3467_v11  ;;  %v970_v11 = vadd.f32 %v3612_v39, %v969_v38 }
 0x33c   :  { %2884 = vmatprep.subr.mxu0 %v3356_v0 }
 0x33d   :  { %2885 = vmatpush3.msra.mxu0 %v3475_v13 }
 0x33e   :  { %2886 = vmatprep.subr.mxu0 %v3356_v0 }
 0x33f   :  { %2887 = vmatpush3.msra.mxu0 %v3483_v15 }
 0x340   :  { %2888 = vmatprep.subr.mxu0 %v3356_v0 }
 0x341   :  { %2889 = vmatpush3.msra.mxu0 %v3491_v17 }
 0x342   :  { %2890 = vmatprep.subr.mxu0 %v3356_v0 }
 0x343   :  { %2891 = vmatpush3.msra.mxu0 %v3534_v26 }
 0x344   :  { %2892 = vmatprep.subr.mxu0 %v3356_v0 }
 0x345   :  { %2893 = vmatpush3.msra.mxu0 %v3537_v27  ;;  %v3918_v27 = vld [vmem:[#allocation8 + $0x58] sm:$0xff] }
 0x346   :  { %2894 = vmatprep.subr.mxu0 %v3356_v0 }
 0x347   :  { %2895 = vmatpush3.msra.mxu0 %v3542_v28  ;;  %v3922_v28 = vld [vmem:[#allocation8 + $0x50] sm:$0xff] }
 0x348   :  { %2896 = vmatprep.subr.mxu0 %v3356_v0 }
 0x349   :  { %2897 = vmatpush3.msra.mxu0 %v3546_v29  ;;  %v3926_v29 = vld [vmem:[#allocation8 + $0x48] sm:$0xff] }
 0x34a   :  { %2898 = vmatprep.subr.mxu0 %v3356_v0 }
 0x34b   :  { %2899 = vmatpush3.msra.mxu0 %v3549_v30  ;;  %v3930_v30 = vld [vmem:[#allocation8 + $0x40] sm:$0xff] }
 0x34c   :  { %2900 = vmatprep.subr.mxu0 %v3356_v0 }
 0x34d   :  { %2901 = vmatpush3.msra.mxu0 %v3552_v31  ;;  %v3934_v31 = vld [vmem:[#allocation8 + $0x38] sm:$0xff] }
 0x34e   :  { %2902 = vmatprep.subr.mxu0 %v3356_v0 }
 0x34f   :  { %2903 = vmatpush3.msra.mxu0 %v3556_v32  ;;  %v3938_v32 = vld [vmem:[#allocation8 + $0x30] sm:$0xff] }
 0x350   :  { %2904 = vmatprep.subr.mxu0 %v3356_v0 }
 0x351   :  { %2905 = vmatpush3.msra.mxu0 %v3560_v33  ;;  %v3942_v33 = vld [vmem:[#allocation8 + $0x28] sm:$0xff] }
 0x352   :  { %2906 = vmatprep.subr.mxu0 %v3356_v0 }
 0x353   :  { %2907 = vmatpush3.msra.mxu0 %v3564_v34  ;;  %v3946_v34 = vld [vmem:[#allocation8 + $0x20] sm:$0xff] }
 0x354   :  { %2908 = vmatprep.subr.mxu0 %v3356_v0 }
 0x355   :  { %2909 = vmatpush3.msra.mxu0 %v3568_v35  ;;  %v3950_v35 = vld [vmem:[#allocation8 + $0x18] sm:$0xff] }
 0x356   :  { %2918 = vmatprep.subr.mxu0 %v3356_v0 }
 0x3d2   :  { %v882_v5 = vpop.f32.mrf.mxu0 }
 0x3d3   :  { %v3850_v8 = vadd.f32 %v3691_v48, %v882_v5 }
 0x3d4   :  { %v2762_v9 = vpop.f32.mrf.mxu0 }
 0x3d5   :  { %886 = vmax.xlane.f32.xlu1 %v3850_v8 }
 0x3f2   :  { %v1055_v13 = vpop.f32.mrf.mxu0 }
 0x3f3   :  { %v1059_v15 = vadd.f32 %v1055_v13, %v970_v11 }
 0x3f4   :  { %v2802_v17 = vpop.f32.mrf.mxu0 }
 0x3f5   :  { %3155 = vtanh.f32 %v1059_v15  ;;  %v1942_v17 = vld [vmem:[#allocation3 + $0x38] sm:$0xff] }
 0x402   :  { %v3156_v26 = vpop.eup %3155 }
 0x403   :  { %2836 = vmatmul.mubr.f32.vlgmr.msra.gmra.mxu1 %v3156_v26 }
 0x404   :  { %2844 = vmatpush3.msra.mxu1 %v3435_v1  ;;  %2875 = vmatprep.mubr.msk.f32.mxu1 %vm3357_vm0, %v3356_v0  ;;  %v1230_v1 = vpop.f32.mrf.mxu0 }
 0x405   :  { %2845 = vmatprep.subr.mxu1 %v3356_v0 }
 0x406   :  { %2846 = vmatpush3.msra.mxu1 %v3437_v2  ;;  %v2842_v2 = vpop.f32.mrf.mxu0 }
 0x407   :  { %2847 = vmatprep.subr.mxu1 %v3356_v0 }
 0x408   :  { %2848 = vmatpush3.msra.mxu1 %v3441_v3  ;;  %v3890_v3 = vld [vmem:[#allocation9] sm:$0xff] }
 0x409   :  { %2849 = vmatprep.subr.mxu1 %v3356_v0 }
 0x40a   :  { %2850 = vmatpush3.msra.mxu1 %v3445_v4  ;;  %v1420_v4 = vld [vmem:[#allocation3 + $0x28] sm:$0xff] }
 0x40b   :  { %2851 = vmatprep.subr.mxu1 %v3356_v0 }
 0x40c   :  { %2852 = vmatpush3.msra.mxu1 %v3452_v7 }
 0x40d   :  { %2853 = vmatprep.subr.mxu1 %v3356_v0 }
 0x40e   :  { %2854 = vmatpush3.msra.mxu1 %v3462_v10 }
 0x40f   :  { %2855 = vmatprep.subr.mxu1 %v3356_v0 }
 0x410   :  { %2856 = vmatpush3.msra.mxu1 %v3470_v12 }
 0x411   :  { %2857 = vmatprep.subr.mxu1 %v3356_v0 }
 0x412   :  { %2858 = vmatpush3.msra.mxu1 %v3478_v14  ;;  %v1231_v14 = vadd.f32 %v3612_v39, %v1230_v1 }
 0x413   :  { %2859 = vmatprep.subr.mxu1 %v3356_v0 }
 0x414   :  { %2860 = vmatpush3.msra.mxu1 %v3486_v16 }
 0x415   :  { %2861 = vmatprep.subr.mxu1 %v3356_v0 }
 0x416   :  { %2862 = vmatpush3.msra.mxu1 %v3494_v18 }
 0x417   :  { %2863 = vmatprep.subr.mxu1 %v3356_v0 }
 0x418   :  { %2864 = vmatpush3.msra.mxu1 %v3500_v19 }
 0x419   :  { %2865 = vmatprep.subr.mxu1 %v3356_v0 }
 0x41a   :  { %2866 = vmatpush3.msra.mxu1 %v3506_v20  ;;  %v3902_v20 = vld [vmem:[#allocation8 + $0x78] sm:$0xff] }
 0x41b   :  { %2867 = vmatprep.subr.mxu1 %v3356_v0 }
 0x41c   :  { %2868 = vmatpush3.msra.mxu1 %v3512_v21 }
 0x41d   :  { %2869 = vmatprep.subr.mxu1 %v3356_v0 }
 0x41e   :  { %2870 = vmatpush3.msra.mxu1 %v3516_v22  ;;  %v3904_v22 = vld [vmem:[#allocation8 + $0x70] sm:$0xff] }
 0x41f   :  { %2871 = vmatprep.subr.mxu1 %v3356_v0 }
 0x420   :  { %2872 = vmatpush3.msra.mxu1 %v3520_v23  ;;  %v3910_v23 = vld [vmem:[#allocation8 + $0x68] sm:$0xff] }
 0x421   :  { %2873 = vmatprep.subr.mxu1 %v3356_v0 }
 0x422   :  { %2874 = vmatpush3.msra.mxu1 %v3524_v24  ;;  %v3914_v24 = vld [vmem:[#allocation8 + $0x60] sm:$0xff] }
 0x423   :  { %2876 = vmatmul.mubr.f32.vlgmr.msra.gmra.mxu1 %v3156_v26  ;;  %2913 = vmatprep.subr.mxu1 %v3356_v0 }
 0x424   :  { %2915 = vmatprep.mubr.msk.f32.mxu1 %vm3357_vm0, %v3356_v0  ;;  %2914 = vmatpush3.msra.mxu1 %v3890_v3 }
 0x425   :  { %2953 = vmatprep.subr.mxu1 %v3356_v0 }
 0x427   :  { %2916 = vmatmul.mubr.msk.f32.vlgmr.msra.gmra.mxu1 %vm111_vm1, %v1420_v4 }
 0x428   :  { %2985 = vmatprep.mubr.msk.f32.mxu1 %vm3357_vm0, %v3356_v0  ;;  %2954 = vmatpush3.msra.mxu1 %v3972_v45 }
 0x429   :  { %2955 = vmatprep.subr.mxu1 %v3356_v0 }
 0x42a   :  { %2956 = vmatpush3.msra.mxu1 %v3974_v46 }
 0x42b   :  { %2957 = vmatprep.subr.mxu1 %v3356_v0 }
 0x42c   :  { %2958 = vmatpush3.msra.mxu1 %v3978_v47 }
 0x42d   :  { %2959 = vmatprep.subr.mxu1 %v3356_v0 }
 0x42e   :  { %2960 = vmatpush3.msra.mxu1 %v3982_v49 }
 0x42f   :  { %2961 = vmatprep.subr.mxu1 %v3356_v0 }
 0x430   :  { %2962 = vmatpush3.msra.mxu1 %v3986_v51 }
 0x431   :  { %2963 = vmatprep.subr.mxu1 %v3356_v0 }
 0x432   :  { %2964 = vmatpush3.msra.mxu1 %v3990_v52 }
 0x433   :  { %2965 = vmatprep.subr.mxu1 %v3356_v0 }
 0x434   :  { %2966 = vmatpush3.msra.mxu1 %v3994_v53 }
 0x435   :  { %2967 = vmatprep.subr.mxu1 %v3356_v0 }
 0x436   :  { %2968 = vmatpush3.msra.mxu1 %v3998_v54 }
 0x437   :  { %2969 = vmatprep.subr.mxu1 %v3356_v0 }
 0x438   :  { %2970 = vmatpush3.msra.mxu1 %v4006_v57 }
 0x439   :  { %2971 = vmatprep.subr.mxu1 %v3356_v0 }
 0x43a   :  { %2972 = vmatpush3.msra.mxu1 %v4010_v58 }
 0x43b   :  { %2973 = vmatprep.subr.mxu1 %v3356_v0 }
 0x43c   :  { %2974 = vmatpush3.msra.mxu1 %v4013_v59 }
 0x43d   :  { %2975 = vmatprep.subr.mxu1 %v3356_v0 }
 0x43e   :  { %2976 = vmatpush3.msra.mxu1 %v4016_v60 }
 0x43f   :  { %2977 = vmatprep.subr.mxu1 %v3356_v0 }
 0x440   :  { %2978 = vmatpush3.msra.mxu1 %v4020_v62 }
 0x441   :  { %2979 = vmatprep.subr.mxu1 %v3356_v0 }
 0x442   :  { %2980 = vmatpush3.msra.mxu1 %v4024_v63 }
 0x443   :  { %2981 = vmatprep.subr.mxu1 %v3356_v0 }
 0x444   :  { %2982 = vmatpush3.msra.mxu1 %v4028_v6 }
 0x445   :  { %2983 = vmatprep.subr.mxu1 %v3356_v0 }
 0x446   :  { %2984 = vmatpush3.msra.mxu1 %v4032_v25 }
 0x447   :  { %2993 = vmatprep.subr.mxu1 %v3356_v0 }
 0x4c3   :  { %v1143_v7 = vpop.f32.mrf.mxu1 }
 0x4c4   :  { %v3898_v10 = vadd.f32 %v3691_v48, %v1143_v7 }
 0x4c5   :  { %v2837_v12 = vpop.f32.mrf.mxu1 }
 0x4c6   :  { %1147 = vmax.xlane.f32.xlu1 %v3898_v10 }
 0x4e3   :  { %v1316_v16 = vpop.f32.mrf.mxu1 }
 0x4e4   :  { %v1320_v18 = vadd.f32 %v1316_v16, %v1231_v14 }
 0x4e5   :  { %v2877_v19 = vpop.f32.mrf.mxu1 }
 0x4e6   :  { %3157 = vtanh.f32 %v1320_v18  ;;  %v366_v19 = vpop.xlane.xlu0 %365 }
 0x4e7   :  { %v4004_v55 = vpop.f32.mrf.mxu1 }
 0x4e8   :  { %v1492_v41 = vadd.f32 %v3612_v39, %v4004_v55 }
 0x4e9   :  { %v2917_v56 = vpop.f32.mrf.mxu1 }
 0x4f3   :  { %v3158_v21 = vpop.eup %3157 }
 0x4f4   :  { %2911 = vmatmul.mubr.f32.vlgmr.msra.gmra.mxu0 %v3158_v21 }
 0x4f5   :  { %2919 = vmatpush3.msra.mxu0 %v3902_v20  ;;  %2950 = vmatprep.mubr.msk.f32.mxu0 %vm3357_vm0, %v3356_v0 }
 0x4f6   :  { %2920 = vmatprep.subr.mxu0 %v3356_v0 }
 0x4f7   :  { %2921 = vmatpush3.msra.mxu0 %v3904_v22 }
 0x4f8   :  { %2922 = vmatprep.subr.mxu0 %v3356_v0 }
 0x4f9   :  { %2923 = vmatpush3.msra.mxu0 %v3910_v23 }
 0x4fa   :  { %2924 = vmatprep.subr.mxu0 %v3356_v0 }
 0x4fb   :  { %2925 = vmatpush3.msra.mxu0 %v3914_v24 }
 0x4fc   :  { %2926 = vmatprep.subr.mxu0 %v3356_v0 }
 0x4fd   :  { %2927 = vmatpush3.msra.mxu0 %v3918_v27 }
 0x4fe   :  { %2928 = vmatprep.subr.mxu0 %v3356_v0 }
 0x4ff   :  { %2929 = vmatpush3.msra.mxu0 %v3922_v28 }
 0x500   :  { %2930 = vmatprep.subr.mxu0 %v3356_v0 }
 0x501   :  { %2931 = vmatpush3.msra.mxu0 %v3926_v29 }
 0x502   :  { %2932 = vmatprep.subr.mxu0 %v3356_v0 }
 0x503   :  { %2933 = vmatpush3.msra.mxu0 %v3930_v30 }
 0x504   :  { %2934 = vmatprep.subr.mxu0 %v3356_v0 }
 0x505   :  { %2935 = vmatpush3.msra.mxu0 %v3934_v31 }
 0x506   :  { %2936 = vmatprep.subr.mxu0 %v3356_v0 }
 0x507   :  { %2937 = vmatpush3.msra.mxu0 %v3938_v32 }
 0x508   :  { %2938 = vmatprep.subr.mxu0 %v3356_v0 }
 0x509   :  { %2939 = vmatpush3.msra.mxu0 %v3942_v33 }
 0x50a   :  { %2940 = vmatprep.subr.mxu0 %v3356_v0 }
 0x50b   :  { %2941 = vmatpush3.msra.mxu0 %v3946_v34 }
 0x50c   :  { %2942 = vmatprep.subr.mxu0 %v3356_v0 }
 0x50d   :  { %2943 = vmatpush3.msra.mxu0 %v3950_v35 }
 0x50e   :  { %2944 = vmatprep.subr.mxu0 %v3356_v0 }
 0x50f   :  { %2945 = vmatpush3.msra.mxu0 %v3954_v42 }
 0x510   :  { %2946 = vmatprep.subr.mxu0 %v3356_v0 }
 0x511   :  { %2947 = vmatpush3.msra.mxu0 %v3958_v43 }
 0x512   :  { %2948 = vmatprep.subr.mxu0 %v3356_v0 }
 0x513   :  { %2949 = vmatpush3.msra.mxu0 %v3962_v44 }
 0x514   :  { %2951 = vmatmul.mubr.f32.vlgmr.msra.gmra.mxu0 %v3158_v21  ;;  %2988 = vmatprep.subr.mxu0 %v3356_v0  ;;  %v626_v21 = vpop.xlane.xlu0 %625 }
 0x515   :  { %2989 = vmatpush3.msra.mxu0 %v3890_v3  ;;  %2990 = vmatprep.mubr.msk.f32.mxu0 %vm3357_vm0, %v3356_v0 }
 0x516   :  { %3028 = vmatprep.subr.mxu0 %v3356_v0 }
 0x518   :  { %2991 = vmatmul.mubr.msk.f32.vlgmr.msra.gmra.mxu0 %vm111_vm1, %v1681_v36 }
 0x519   :  { %3029 = vmatpush3.msra.mxu0 %v3972_v45  ;;  %3060 = vmatprep.mubr.msk.f32.mxu0 %vm3357_vm0, %v3356_v0 }
 0x51a   :  { %3030 = vmatprep.subr.mxu0 %v3356_v0 }
 0x51b   :  { %3031 = vmatpush3.msra.mxu0 %v3974_v46 }
 0x51c   :  { %3032 = vmatprep.subr.mxu0 %v3356_v0 }
 0x51d   :  { %3033 = vmatpush3.msra.mxu0 %v3978_v47 }
 0x51e   :  { %3034 = vmatprep.subr.mxu0 %v3356_v0 }
 0x51f   :  { %3035 = vmatpush3.msra.mxu0 %v3982_v49 }
 0x520   :  { %3036 = vmatprep.subr.mxu0 %v3356_v0 }
 0x521   :  { %3037 = vmatpush3.msra.mxu0 %v3986_v51 }
 0x522   :  { %3038 = vmatprep.subr.mxu0 %v3356_v0 }
 0x523   :  { %3039 = vmatpush3.msra.mxu0 %v3990_v52 }
 0x524   :  { %3040 = vmatprep.subr.mxu0 %v3356_v0 }
 0x525   :  { %3041 = vmatpush3.msra.mxu0 %v3994_v53 }
 0x526   :  { %3042 = vmatprep.subr.mxu0 %v3356_v0 }
 0x527   :  { %3043 = vmatpush3.msra.mxu0 %v3998_v54 }
 0x528   :  { %3044 = vmatprep.subr.mxu0 %v3356_v0 }
 0x529   :  { %3045 = vmatpush3.msra.mxu0 %v4006_v57 }
 0x52a   :  { %3046 = vmatprep.subr.mxu0 %v3356_v0 }
 0x52b   :  { %3047 = vmatpush3.msra.mxu0 %v4010_v58 }
 0x52c   :  { %3048 = vmatprep.subr.mxu0 %v3356_v0 }
 0x52d   :  { %3049 = vmatpush3.msra.mxu0 %v4013_v59 }
 0x52e   :  { %3050 = vmatprep.subr.mxu0 %v3356_v0 }
 0x52f   :  { %3051 = vmatpush3.msra.mxu0 %v4016_v60 }
 0x530   :  { %3052 = vmatprep.subr.mxu0 %v3356_v0 }
 0x531   :  { %3053 = vmatpush3.msra.mxu0 %v4020_v62 }
 0x532   :  { %3054 = vmatprep.subr.mxu0 %v3356_v0 }
 0x533   :  { %3055 = vmatpush3.msra.mxu0 %v4024_v63 }
 0x534   :  { %3056 = vmatprep.subr.mxu0 %v3356_v0 }
 0x535   :  { %3057 = vmatpush3.msra.mxu0 %v4028_v6 }
 0x536   :  { %3058 = vmatprep.subr.mxu0 %v3356_v0 }
 0x537   :  { %3059 = vmatpush3.msra.mxu0 %v4032_v25 }
 0x538   :  { %3068 = vmatprep.subr.mxu0 %v3356_v0 }
 0x5b4   :  { %v1404_v37 = vpop.f32.mrf.mxu0 }
 0x5b5   :  { %v4074_v38 = vadd.f32 %v3691_v48, %v1404_v37 }
 0x5b6   :  { %v2912_v40 = vpop.f32.mrf.mxu0 }
 0x5b7   :  { %1408 = vmax.xlane.f32.xlu0 %v4074_v38 }
 0x5d4   :  { %v1577_v5 = vpop.f32.mrf.mxu0 }
 0x5d5   :  { %v1581_v9 = vadd.f32 %v1577_v5, %v1492_v41 }
 0x5d6   :  { %v2952_v11 = vpop.f32.mrf.mxu0 }
 0x5d7   :  { %3159 = vtanh.f32 %v1581_v9 }
 0x5d8   :  { %v1752_v39 = vpop.f32.mrf.mxu0 }
 0x5da   :  { %v2992_v15 = vpop.f32.mrf.mxu0 }
 0x5e4   :  { %v3160_v13 = vpop.eup %3159 }
 0x5e5   :  { %2986 = vmatmul.mubr.f32.vlgmr.msra.gmra.mxu1 %v3160_v13 }
 0x5e6   :  { %2994 = vmatpush3.msra.mxu1 %v3902_v20  ;;  %3025 = vmatprep.mubr.msk.f32.mxu1 %vm3357_vm0, %v3356_v0 }
 0x5e7   :  { %2995 = vmatprep.subr.mxu1 %v3356_v0 }
 0x5e8   :  { %2996 = vmatpush3.msra.mxu1 %v3904_v22 }
 0x5e9   :  { %2997 = vmatprep.subr.mxu1 %v3356_v0 }
 0x5ea   :  { %2998 = vmatpush3.msra.mxu1 %v3910_v23 }
 0x5eb   :  { %2999 = vmatprep.subr.mxu1 %v3356_v0 }
 0x5ec   :  { %3000 = vmatpush3.msra.mxu1 %v3914_v24 }
 0x5ed   :  { %3001 = vmatprep.subr.mxu1 %v3356_v0 }
 0x5ee   :  { %3002 = vmatpush3.msra.mxu1 %v3918_v27 }
 0x5ef   :  { %3003 = vmatprep.subr.mxu1 %v3356_v0 }
 0x5f0   :  { %3004 = vmatpush3.msra.mxu1 %v3922_v28 }
 0x5f1   :  { %3005 = vmatprep.subr.mxu1 %v3356_v0 }
 0x5f2   :  { %3006 = vmatpush3.msra.mxu1 %v3926_v29 }
 0x5f3   :  { %3007 = vmatprep.subr.mxu1 %v3356_v0 }
 0x5f4   :  { %3008 = vmatpush3.msra.mxu1 %v3930_v30 }
 0x5f5   :  { %3009 = vmatprep.subr.mxu1 %v3356_v0 }
 0x5f6   :  { %3010 = vmatpush3.msra.mxu1 %v3934_v31 }
 0x5f7   :  { %3011 = vmatprep.subr.mxu1 %v3356_v0 }
 0x5f8   :  { %3012 = vmatpush3.msra.mxu1 %v3938_v32 }
 0x5f9   :  { %3013 = vmatprep.subr.mxu1 %v3356_v0 }
 0x5fa   :  { %3014 = vmatpush3.msra.mxu1 %v3942_v33 }
 0x5fb   :  { %3015 = vmatprep.subr.mxu1 %v3356_v0 }
 0x5fc   :  { %3016 = vmatpush3.msra.mxu1 %v3946_v34 }
 0x5fd   :  { %3017 = vmatprep.subr.mxu1 %v3356_v0 }
 0x5fe   :  { %3018 = vmatpush3.msra.mxu1 %v3950_v35 }
 0x5ff   :  { %3019 = vmatprep.subr.mxu1 %v3356_v0 }
 0x600   :  { %3020 = vmatpush3.msra.mxu1 %v3954_v42 }
 0x601   :  { %3021 = vmatprep.subr.mxu1 %v3356_v0 }
 0x602   :  { %3022 = vmatpush3.msra.mxu1 %v3958_v43 }
 0x603   :  { %3023 = vmatprep.subr.mxu1 %v3356_v0 }
 0x604   :  { %3024 = vmatpush3.msra.mxu1 %v3962_v44 }
 0x605   :  { %3026 = vmatmul.mubr.f32.vlgmr.msra.gmra.mxu1 %v3160_v13  ;;  %3063 = vmatprep.subr.mxu1 %v3356_v0 }
 0x606   :  { %3064 = vmatpush3.msra.mxu1 %v3890_v3  ;;  %3065 = vmatprep.mubr.msk.f32.mxu1 %vm3357_vm0, %v3356_v0  ;;  %v4158_v3 = vld [vmem:[%s4217_s4] ss:$0 sm:$0xff] }
 0x607   :  { %3103 = vmatprep.subr.mxu1 %v3356_v0  ;;  %v1753_v4 = vadd.f32 %v4158_v3, %v1752_v39 }
 0x609   :  { %3066 = vmatmul.mubr.msk.f32.vlgmr.msra.gmra.mxu1 %vm111_vm1, %v1942_v17 }
 0x60a   :  { %3104 = vmatpush3.msra.mxu1 %v3972_v45  ;;  %3135 = vmatprep.mubr.msk.f32.mxu1 %vm3357_vm0, %v3356_v0 }
 0x60b   :  { %3105 = vmatprep.subr.mxu1 %v3356_v0 }
 0x60c   :  { %3106 = vmatpush3.msra.mxu1 %v3974_v46 }
 0x60d   :  { %3107 = vmatprep.subr.mxu1 %v3356_v0 }
 0x60e   :  { %3108 = vmatpush3.msra.mxu1 %v3978_v47 }
 0x60f   :  { %3109 = vmatprep.subr.mxu1 %v3356_v0 }
 0x610   :  { %3110 = vmatpush3.msra.mxu1 %v3982_v49 }
 0x611   :  { %3111 = vmatprep.subr.mxu1 %v3356_v0 }
 0x612   :  { %3112 = vmatpush3.msra.mxu1 %v3986_v51 }
 0x613   :  { %3113 = vmatprep.subr.mxu1 %v3356_v0 }
 0x614   :  { %3114 = vmatpush3.msra.mxu1 %v3990_v52 }
 0x615   :  { %3115 = vmatprep.subr.mxu1 %v3356_v0 }
 0x616   :  { %3116 = vmatpush3.msra.mxu1 %v3994_v53 }
 0x617   :  { %3117 = vmatprep.subr.mxu1 %v3356_v0 }
 0x618   :  { %3118 = vmatpush3.msra.mxu1 %v3998_v54 }
 0x619   :  { %3119 = vmatprep.subr.mxu1 %v3356_v0 }
 0x61a   :  { %3120 = vmatpush3.msra.mxu1 %v4006_v57 }
 0x61b   :  { %3121 = vmatprep.subr.mxu1 %v3356_v0 }
 0x61c   :  { %3122 = vmatpush3.msra.mxu1 %v4010_v58 }
 0x61d   :  { %3123 = vmatprep.subr.mxu1 %v3356_v0 }
 0x61e   :  { %3124 = vmatpush3.msra.mxu1 %v4013_v59 }
 0x61f   :  { %3125 = vmatprep.subr.mxu1 %v3356_v0 }
 0x620   :  { %3126 = vmatpush3.msra.mxu1 %v4016_v60 }
 0x621   :  { %3127 = vmatprep.subr.mxu1 %v3356_v0 }
 0x622   :  { %3128 = vmatpush3.msra.mxu1 %v4020_v62  ;;  %v627_v62 = vsub.f32 %v3772_v61, %v626_v21 }
 0x623   :  { %3129 = vmatprep.subr.mxu1 %v3356_v0 }
 0x624   :  { %3130 = vmatpush3.msra.mxu1 %v4024_v63 }
 0x625   :  { %3131 = vmatprep.subr.mxu1 %v3356_v0 }
 0x626   :  { %3132 = vmatpush3.msra.mxu1 %v4028_v6  ;;  %v628_v6 = vmul.f32 1.442695, %v627_v62 }
 0x627   :  { %3133 = vmatprep.subr.mxu1 %v3356_v0 }
 0x628   :  { %3134 = vmatpush3.msra.mxu1 %v4032_v25 }
 0x6a5   :  { %v1665_v26 = vpop.f32.mrf.mxu1 }
 0x6a6   :  { %v4152_v1 = vadd.f32 %v3691_v48, %v1665_v26 }
 0x6a7   :  { %v2987_v2 = vpop.f32.mrf.mxu1 }
 0x6a8   :  { %1669 = vmax.xlane.f32.xlu1 %v4152_v1 }
 0x6c5   :  { %v1838_v7 = vpop.f32.mrf.mxu1 }
 0x6c6   :  { %v1842_v12 = vadd.f32 %v1838_v7, %v1753_v4 }
 0x6c7   :  { %v3027_v14 = vpop.f32.mrf.mxu1 }
 0x6c8   :  { %3161 = vtanh.f32 %v1842_v12 }
 0x6c9   :  { %v2013_v48 = vpop.f32.mrf.mxu1 }
 0x6cb   :  { %v3067_v18 = vpop.f32.mrf.mxu1 }
 0x6d5   :  { %v3162_v16 = vpop.eup %3161 }
 0x6d6   :  { %3061 = vmatmul.mubr.f32.vlgmr.msra.gmra.mxu0 %v3162_v16 }
 0x6d7   :  { %3069 = vmatpush3.msra.mxu0 %v3902_v20  ;;  %3100 = vmatprep.mubr.msk.f32.mxu0 %vm3357_vm0, %v3356_v0  ;;  %v367_v20 = vsub.f32 %v3694_v50, %v366_v19 }
 0x6d8   :  { %3070 = vmatprep.subr.mxu0 %v3356_v0 }
 0x6d9   :  { %3071 = vmatpush3.msra.mxu0 %v3904_v22  ;;  %v887_v22 = vpop.xlane.xlu1 %886 }
 0x6da   :  { %3072 = vmatprep.subr.mxu0 %v3356_v0 }
 0x6db   :  { %3073 = vmatpush3.msra.mxu0 %v3910_v23  ;;  %v368_v23 = vmul.f32 1.442695, %v367_v20 }
 0x6dc   :  { %3074 = vmatprep.subr.mxu0 %v3356_v0 }
 0x6dd   :  { %3075 = vmatpush3.msra.mxu0 %v3914_v24  ;;  %v888_v24 = vsub.f32 %v3850_v8, %v887_v22  ;;  %3163 = vpow2.f32 %v368_v23  ;;  %v1148_v63 = vpop.xlane.xlu1 %1147 }
 0x6de   :  { %3076 = vmatprep.subr.mxu0 %v3356_v0  ;;  %v1149_v25 = vsub.f32 %v3898_v10, %v1148_v63 }
 0x6df   :  { %3077 = vmatpush3.msra.mxu0 %v3918_v27  ;;  %v1409_v27 = vpop.xlane.xlu0 %1408 }
 0x6e0   :  { %3078 = vmatprep.subr.mxu0 %v3356_v0  ;;  %v1150_v37 = vmul.f32 1.442695, %v1149_v25 }
 0x6e1   :  { %3079 = vmatpush3.msra.mxu0 %v3922_v28  ;;  %v889_v28 = vmul.f32 1.442695, %v888_v24 }
 0x6e2   :  { %3080 = vmatprep.subr.mxu0 %v3356_v0 }
 0x6e3   :  { %3081 = vmatpush3.msra.mxu0 %v3926_v29  ;;  %v1410_v29 = vsub.f32 %v4074_v38, %v1409_v27  ;;  %3165 = vpow2.f32 %v889_v28 }
 0x6e4   :  { %3082 = vmatprep.subr.mxu0 %v3356_v0 }
 0x6e5   :  { %3083 = vmatpush3.msra.mxu0 %v3930_v30 }
 0x6e6   :  { %3084 = vmatprep.subr.mxu0 %v3356_v0 }
 0x6e7   :  { %3085 = vmatpush3.msra.mxu0 %v3934_v31  ;;  %v3198_v31 = vld [vmem:[%s4219_s6] ss:$0 sm:$0xff]  ;;  %s3358_s6 = smov [#allocation13]  }
 0x6e8   :  { %3086 = vmatprep.subr.mxu0 %v3356_v0  ;;  %s2225_s12 = sshll.u32 %s3358_s6, 4  ;;  %s2226_s12 = int_to_ptr.vmem [resolvable:$true] %s2225_s12 }
 0x6e9   :  { %3087 = vmatpush3.msra.mxu0 %v3938_v32  ;;  %s3299_s13 = scalar_lea.vmem %s2226_s12, 128  ;;  %p3304_p12 = scmp.lt.s32.totalorder %s2226_s12, %s2226_s12 }
 0x6ea   :  { %3088 = vmatprep.subr.mxu0 %v3356_v0  ;;  %p3300_p11 = scmp.ne.s32.totalorder %s2226_s12, %s3299_s13  ;;  %p3305_p13 = scmp.lt.s32.totalorder %s3299_s13, %s3299_s13 }
 0x6eb   :  { %3089 = vmatpush3.msra.mxu0 %v3942_v33  ;;  %v3164_v33 = vpop.eup %3163 }
 0x6ec   :  { %3090 = vmatprep.subr.mxu0 %v3356_v0  ;;  %p3306_p0 = por %p3305_p13, %p3304_p12 }
 0x6ed   :  { %3091 = vmatpush3.msra.mxu0 %v3946_v34 }
 0x6ee   :  { %3092 = vmatprep.subr.mxu0 %v3356_v0  ;;  %p3307_p1 = pnand %p3306_p0, %p3300_p11 }
 0x6ef   :  { %3093 = vmatpush3.msra.mxu0 %v3950_v35  ;;  %v2014_v35 = vadd.f32 %v4158_v3, %v2013_v48 }
 0x6f0   :  { %3094 = vmatprep.subr.mxu0 %v3356_v0  ;;  %v3166_v34 = vpop.eup %3165 }
 0x6f1   :  { %3095 = vmatpush3.msra.mxu0 %v3954_v42 }
 0x6f2   :  { %3096 = vmatprep.subr.mxu0 %v3356_v0 }
 0x6f3   :  { %3097 = vmatpush3.msra.mxu0 %v3958_v43 }
 0x6f4   :  { %3098 = vmatprep.subr.mxu0 %v3356_v0  ;;  %v1411_v0 = vmul.f32 1.442695, %v1410_v29 }
 0x6f5   :  { %3099 = vmatpush3.msra.mxu0 %v3962_v44 }
 0x6f6   :  { %3101 = vmatmul.mubr.f32.vlgmr.msra.gmra.mxu0 %v3162_v16  ;;  %3167 = vpow2.f32 %v1411_v0 }
 0x703   :  { %v3168_v8 = vpop.eup %3167 }
 0x731   :  { %v1670_v36 = vpop.xlane.xlu1 %1669 }
 0x732   :  { %v1671_v38 = vsub.f32 %v4152_v1, %v1670_v36 }
 0x734   :  { %v1672_v40 = vmul.f32 1.442695, %v1671_v38 }
 0x796   :  { %v1926_v30 = vpop.f32.mrf.mxu0 }
 0x797   :  { %v1927_v32 = vadd.f32 %v3198_v31, %v1926_v30 }
 0x798   :  { %v3062_v50 = vpop.f32.mrf.mxu0 }
 0x799   :  { %1930 = vmax.xlane.f32.xlu0 %v1927_v32 }
 0x79d   :  { %370 = vadd.xlane.f32.xlu0 %v3164_v33 }
 0x7a1   :  { %891 = vadd.xlane.f32.xlu0 %v3166_v34 }
 0x7a5   :  { %1413 = vadd.xlane.f32.xlu0 %v3168_v8 }
 0x7b6   :  { %v2099_v42 = vpop.f32.mrf.mxu0 }
 0x7b7   :  { %v2103_v43 = vadd.f32 %v2099_v42, %v2014_v35 }
 0x7b8   :  { %v3102_v44 = vpop.f32.mrf.mxu0 }
 0x7b9   :  { %3169 = vtanh.f32 %v2103_v43 }
 0x7c6   :  { %v3170_v45 = vpop.eup %3169 }
 0x7c7   :  { %2206 = vst [vmem:[#allocation13] sm:$0xff] %v3170_v45  ;;  %3136 = vmatmul.mubr.f32.vlgmr.msra.gmra.mxu1 %v3170_v45 }
 0x822   :  { %v1931_v46 = vpop.xlane.xlu0 %1930 }
 0x823   :  { %v1932_v47 = vsub.f32 %v1927_v32, %v1931_v46 }
 0x825   :  { %v1933_v49 = vmul.f32 1.442695, %v1932_v47 }
 0x826   :  { %v371_v51 = vpop.xlane.xlu0 %370 }
 0x827   :  { %3171 = vpow2.f32 %v1933_v49 }
 0x828   :  { %3173 = vrcp.f32 %v371_v51 }
 0x82a   :  { %v892_v52 = vpop.xlane.xlu0 %891 }
 0x82b   :  { %3175 = vrcp.f32 %v892_v52 }
 0x82e   :  { %v1414_v53 = vpop.xlane.xlu0 %1413 }
 0x82f   :  { %3177 = vrcp.f32 %v1414_v53 }
 0x830   :  { %3179 = vpow2.f32 %v628_v6 }
 0x831   :  { %3181 = vpow2.f32 %v1150_v37 }
 0x832   :  { %3183 = vpow2.f32 %v1672_v40 }
 0x834   :  { %v3172_v54 = vpop.eup %3171 }
 0x835   :  { %v3174_v55 = vpop.eup %3173  ;;  %1935 = vadd.xlane.f32.xlu0 %v3172_v54 }
 0x836   :  { %v373_v56 = vmul.f32 %v3174_v55, %v3164_v33 }
 0x838   :  { %v3176_v57 = vpop.eup %3175  ;;  %374 = vst [vmem:[#allocation12] sm:$0xff] %v373_v56 }
 0x839   :  { %v894_v58 = vmul.f32 %v3176_v57, %v3166_v34 }
 0x83b   :  { %896 = vst [vmem:[#allocation12 + $0x10] sm:$0xff] %v894_v58 }
 0x83c   :  { %v3178_v59 = vpop.eup %3177 }
 0x83d   :  { %v1416_v60 = vmul.f32 %v3178_v59, %v3168_v8  ;;  %v3180_v11 = vpop.eup %3179 }
 0x83e   :  { %v3182_v13 = vpop.eup %3181 }
 0x83f   :  { %1418 = vst [vmem:[#allocation12 + $0x20] sm:$0xff] %v1416_v60  ;;  %v3184_v61 = vpop.eup %3183 }
 0x887   :  { %v2187_v41 = vpop.f32.mrf.mxu1 }
 0x888   :  { %v2188_v5 = vadd.f32 %v3198_v31, %v2187_v41 }
 0x889   :  { %v3137_v9 = vpop.f32.mrf.mxu1 }
 0x88a   :  { %2191 = vmax.xlane.f32.xlu1 %v2188_v5 }
 0x88e   :  { %630 = vadd.xlane.f32.xlu1 %v3180_v11 }
 0x892   :  { %1152 = vadd.xlane.f32.xlu1 %v3182_v13 }
 0x896   :  { %1674 = vadd.xlane.f32.xlu1 %v3184_v61 }
 0x8be   :  { %v1936_v39 = vpop.xlane.xlu0 %1935 }
 0x8bf   :  { %3185 = vrcp.f32 %v1936_v39 }
 0x8cc   :  { %v3186_v10 = vpop.eup %3185 }
 0x8cd   :  { %v1938_v15 = vmul.f32 %v3186_v10, %v3172_v54 }
 0x8cf   :  { %1940 = vst [vmem:[#allocation12 + $0x30] sm:$0xff] %v1938_v15 }
 0x913   :  { %v2192_v17 = vpop.xlane.xlu1 %2191 }
 0x914   :  { %v2193_v26 = vsub.f32 %v2188_v5, %v2192_v17 }
 0x916   :  { %v2194_v1 = vmul.f32 1.442695, %v2193_v26 }
 0x917   :  { %v631_v2 = vpop.xlane.xlu1 %630 }
 0x918   :  { %3187 = vpow2.f32 %v2194_v1 }
 0x919   :  { %3189 = vrcp.f32 %v631_v2 }
 0x91b   :  { %v1153_v3 = vpop.xlane.xlu1 %1152 }
 0x91c   :  { %3191 = vrcp.f32 %v1153_v3 }
 0x91f   :  { %v1675_v4 = vpop.xlane.xlu1 %1674 }
 0x920   :  { %3193 = vrcp.f32 %v1675_v4 }
 0x925   :  { %v3188_v7 = vpop.eup %3187 }
 0x926   :  { %v3190_v12 = vpop.eup %3189  ;;  %2196 = vadd.xlane.f32.xlu1 %v3188_v7 }
 0x927   :  { %v633_v14 = vmul.f32 %v3190_v12, %v3180_v11 }
 0x929   :  { %v3192_v16 = vpop.eup %3191  ;;  %635 = vst [vmem:[#allocation12 + $0x8] sm:$0xff] %v633_v14 }
 0x92a   :  { %v1155_v48 = vmul.f32 %v3192_v16, %v3182_v13 }
 0x92c   :  { %1157 = vst [vmem:[#allocation12 + $0x18] sm:$0xff] %v1155_v48 }
 0x92d   :  { %v3194_v18 = vpop.eup %3193 }
 0x92e   :  { %v1677_v19 = vmul.f32 %v3194_v18, %v3184_v61 }
 0x930   :  { %1679 = vst [vmem:[#allocation12 + $0x28] sm:$0xff] %v1677_v19 }
 0x931   :  { %3310 = shalt.err (!%p3307_p1)
}
 0x932   :  { %2228 = dma.vmem_to_hbm [thread:$0]  %s2226_s12, 128, %s4221_s8, [#allocation14]  }
 0x933   :  { %s3359_s16 = smov [#allocation12]  }
 0x934   :  { %s2212_s17 = sshll.u32 %s3359_s16, 4  ;;  %s2213_s17 = int_to_ptr.vmem [resolvable:$true] %s2212_s17 }
 0x935   :  { %s3319_s19 = scalar_lea.vmem %s2213_s17, 1024  ;;  %p3324_p3 = scmp.lt.s32.totalorder %s2213_s17, %s2213_s17 }
 0x936   :  { %p3320_p2 = scmp.ne.s32.totalorder %s2213_s17, %s3319_s19  ;;  %p3325_p4 = scmp.lt.s32.totalorder %s3319_s19, %s3319_s19 }
 0x938   :  { %p3326_p5 = por %p3325_p4, %p3324_p3 }
 0x93a   :  { %p3327_p6 = pnand %p3326_p5, %p3320_p2 }
 0x9af   :  { %v2197_v20 = vpop.xlane.xlu1 %2196 }
 0x9b0   :  { %3195 = vrcp.f32 %v2197_v20 }
 0x9bd   :  { %v3196_v21 = vpop.eup %3195 }
 0x9be   :  { %v2199_v22 = vmul.f32 %v3196_v21, %v3188_v7 }
 0x9c0   :  { %2201 = vst [vmem:[#allocation12 + $0x38] sm:$0xff] %v2199_v22 }
 0x9c1   :  { %3330 = shalt.err (!%p3327_p6)
}
 0x9c2   :  { %2218 = dma.vmem_to_hbm [thread:$0]  %s2213_s17, 1024, %s4220_s7, [#allocation5], %s3352_s1, %s3352_s1, %s3353_s18  }
 0x9c3   :  { %3345 = dma.done.wait [#allocation5], 1024  }
 0x9c4   :  { %3346 = vsyncadd [#allocation5], 4294966272 }
 0x9c5   :  { %3347 = dma.done.wait [#allocation14], 128  }
 0x9c6   :  { %3348 = vsyncadd [#allocation14], 4294967168 }
 0x9c7   :  { %2235 = vsyncpa [#allocation4], 1 }
 0x9c8   :  { %2236 = vsyncpa [#allocation7], 1 }
 0x9c9   :  { %2237 = vsyncpa [#allocation10], 1 }
 0x9ca   :  { %2238 = vsyncpa [#allocation5], 1 }
 0x9cb   :  { %2239 = vsyncpa [#allocation14], 1 }

</bundles_post_ra>
